<compile_context>
chip_gen: v7x
topology: tpu7x:2x2x1
jax: 0.10.0
libtpu: 0.0.40
codegen_flags: <defaults>
</compile_context>

<pallas_src>
import functools
import math

import jax
import jax.numpy as jnp
from jax import lax
from jax.experimental import pallas as pl
from jax.experimental.pallas import tpu as pltpu


# ----------------------------------------------------------------------------
# Single fused kernel: 3x TransformerConv + global_mean_pool + Linear
# ----------------------------------------------------------------------------
def _gcn_kernel(idx_col_ref, dst_row_ref, batch_row_ref, x_ref, eemb_ref,
                w1_ref, b1_ref, w2_ref, b2_ref, w3_ref, b3_ref,
                we_ref, lin_w_ref, lin_b_ref, o_ref):
    n_nodes = x_ref.shape[0]
    n_edges = eemb_ref.shape[0]
    n_graphs = o_ref.shape[0]
    c = w1_ref.shape[1] // 4
    scale = 1.0 / math.sqrt(c)
    neg = jnp.float32(-1e30)

    # --- one-hot gather / scatter maps: built once, reused for all 3 layers ---
    dst_col = idx_col_ref[:, 0:1]                                  # [E, 1] i32
    src_col = idx_col_ref[:, 1:2]                                  # [E, 1] i32
    node_ids_en = lax.broadcasted_iota(jnp.int32, (n_edges, n_nodes), 1)
    g_dst = (node_ids_en == dst_col).astype(jnp.bfloat16)          # [E, N]
    g_src = (node_ids_en == src_col).astype(jnp.bfloat16)          # [E, N]
    node_ids_ne = lax.broadcasted_iota(jnp.int32, (n_nodes, n_edges), 0)
    m = node_ids_ne == dst_row_ref[...]                            # [N, E] bool
    m_f = m.astype(jnp.float32)

    # --- edge projections for all three layers in ONE lane-dense matmul ---
    e_proj_all = jnp.dot(eemb_ref[...].astype(jnp.bfloat16), we_ref[...],
                         preferred_element_type=jnp.float32)       # [E, 3C]

    def tconv(h, e_proj, w_ref, b_ref, relu):
        # fused Q|K|V|Skip projection (lane-dense 4C output)
        h_bf = h.astype(jnp.bfloat16)
        proj = jnp.dot(h_bf, w_ref[...], preferred_element_type=jnp.float32)
        proj = proj + b_ref[...]                                   # [N, 4C]
        q = proj[:, 0:c]
        kv = proj[:, c:3 * c]
        skip = proj[:, 3 * c:4 * c]

        # per-edge gathers via one-hot MXU matmuls
        q_e = jnp.dot(g_dst, q.astype(jnp.bfloat16),
                      preferred_element_type=jnp.float32)          # [E, C]
        kv_e = jnp.dot(g_src, kv.astype(jnp.bfloat16),
                       preferred_element_type=jnp.float32)         # [E, 2C]
        k_e = kv_e[:, 0:c] + e_proj
        v_e = kv_e[:, c:2 * c] + e_proj

        # per-destination softmax over incoming edges (f32; exp on E only)
        logits = jnp.sum(q_e * k_e, axis=-1) * scale               # [E]
        lg = logits.reshape(1, n_edges)                            # [1, E]
        seg_max = jnp.max(jnp.where(m, lg, neg), axis=-1,
                          keepdims=True)                           # [N, 1]
        smax_e = jnp.max(jnp.where(m, seg_max, neg), axis=0,
                         keepdims=True)                            # [1, E]
        w_row = jnp.exp(lg - smax_e)                               # [1, E] (<=1)
        num = m_f * w_row                                          # [N, E]
        denom = jnp.sum(num, axis=-1, keepdims=True) + 1e-16       # [N, 1]
        alpha = num * pl.reciprocal(denom, approx=True)            # [N, E]

        # aggregate to destination nodes + skip + activation epilogue
        agg = jnp.dot(alpha.astype(jnp.bfloat16), v_e.astype(jnp.bfloat16),
                      preferred_element_type=jnp.float32)          # [N, C]
        out = agg + skip
        if relu:
            out = jnp.maximum(out, 0.0)
        return out

    h = tconv(x_ref[...], e_proj_all[:, 0:c],       w1_ref, b1_ref, relu=True)
    h = tconv(h,          e_proj_all[:, c:2 * c],   w2_ref, b2_ref, relu=True)
    h = tconv(h,          e_proj_all[:, 2 * c:3 * c], w3_ref, b3_ref, relu=False)

    # --- global_mean_pool + final Linear (VPU multiply + lane reduce) ---
    g_iota = lax.broadcasted_iota(jnp.int32, (n_graphs, n_nodes), 0)
    pmask = (g_iota == batch_row_ref[...]).astype(jnp.float32)     # [B, N]
    pooled_sum = jnp.dot(pmask.astype(jnp.bfloat16), h.astype(jnp.bfloat16),
                         preferred_element_type=jnp.float32)       # [B, C]
    cnt = jnp.sum(pmask, axis=-1, keepdims=True)                   # [B, 1]
    pooled = pooled_sum / jnp.maximum(cnt, 1.0)
    # TODO(synk): F.dropout(p=0.5) is identity in eval mode; training-mode RNG dropout omitted.
    out = jnp.sum(pooled * lin_w_ref[...], axis=-1, keepdims=True) \
        + lin_b_ref[...]                                           # [B, 1]
    o_ref[...] = out.astype(o_ref.dtype)


def gcn_pallas(idx_col, dst_row, batch_row, x, edge_emb, params, num_graphs):
    n, din = x.shape
    e, de = edge_emb.shape
    p1, p2, p3 = params["conv1"], params["conv2"], params["conv3"]
    c = p1["w_qkvs"].shape[1] // 4

    # advisory cost estimate
    flops = 2 * e * de * 3 * c
    d_in = din
    for _ in range(3):
        flops += 2 * (n * d_in * 4 * c + e * n * c + e * n * 2 * c + n * e * c)
        d_in = c
    flops += 2 * (num_graphs * n * c + num_graphs * c)
    bytes_accessed = (x.size * 4 + edge_emb.size * 4 + idx_col.size * 4
                      + dst_row.size * 4 + batch_row.size * 4
                      + (p1["w_qkvs"].size + p2["w_qkvs"].size
                         + p3["w_qkvs"].size + params["w_e_packed"].size) * 2
                      + (p1["b_qkvs"].size + p2["b_qkvs"].size
                         + p3["b_qkvs"].size) * 4
                      + params["lin_w"].size * 4 + 4
                      + num_graphs * 4)

    vmem = pl.BlockSpec(memory_space=pltpu.MemorySpace.VMEM)
    return pl.pallas_call(
        _gcn_kernel,
        out_shape=jax.ShapeDtypeStruct((num_graphs, 1), jnp.float32),
        in_specs=[vmem] * 14,
        out_specs=vmem,
        cost_estimate=pl.CostEstimate(flops=flops, transcendentals=3 * e,
                                      bytes_accessed=bytes_accessed),
    )(idx_col, dst_row, batch_row, x, edge_emb,
      p1["w_qkvs"], p1["b_qkvs"], p2["w_qkvs"], p2["b_qkvs"],
      p3["w_qkvs"], p3["b_qkvs"],
      params["w_e_packed"], params["lin_w"], params["lin_b"])


# ----------------------------------------------------------------------------
# Model glue (plain JAX: embedding gathers, index layouts, parameter setup)
# ----------------------------------------------------------------------------
def encode(codes, table, vocab):
    """Atom/Bond encoder: sum of per-feature embedding lookups (XLA gather)."""
    n_feats = codes.shape[1]
    offsets = (jnp.arange(n_feats, dtype=codes.dtype) * vocab)[None, :]
    rows = jnp.take(table, codes + offsets, axis=0)        # [R, F, D]
    return rows.sum(axis=1).astype(jnp.float32)            # [R, D]


def gcn_forward(params, x, edge_index, edge_attr, batch, num_graphs):
    h = encode(x, params["atom_table"], params["atom_vocab"])
    e = encode(edge_attr, params["bond_table"], params["bond_vocab"])

    src = edge_index[0]   # j (message source)
    dst = edge_index[1]   # i (message target / softmax segment index)
    n_edges = src.shape[0]
    idx_col = jnp.stack([dst, src], axis=1).astype(jnp.int32)       # [E, 2]
    dst_row = dst.reshape(1, n_edges).astype(jnp.int32)             # [1, E]
    batch_row = batch.reshape(1, -1).astype(jnp.int32)              # [1, N]

    return gcn_pallas(idx_col, dst_row, batch_row, h, e, params, num_graphs)


def init_params(key, hidden, node_dim=128, edge_dim=128,
                atom_feats=9, atom_vocab=16, bond_feats=3, bond_vocab=8):
    ks = iter(jax.random.split(key, 64))

    def nrm(shape, fan_in):
        return (1.0 / math.sqrt(fan_in)) * jax.random.normal(next(ks), shape, jnp.float32)

    def conv(in_dim, out_dim):
        # Wq | Wk | Wv | Wskip fused into one lane-dense [in, 4*out] matrix.
        w = jnp.concatenate([nrm((in_dim, out_dim), in_dim) for _ in range(4)], axis=1)
        b = jnp.concatenate([nrm((1, out_dim), in_dim) for _ in range(4)], axis=1)
        return {"w_qkvs": w.astype(jnp.bfloat16),   # MXU operands pre-cast once
                "b_qkvs": b}                         # biases stay f32

    # lin_edge weights of the three layers packed side by side: [de, 3C]
    w_e_packed = jnp.concatenate(
        [nrm((edge_dim, hidden), edge_dim) for _ in range(3)], axis=1)

    return {
        "atom_table": nrm((atom_feats * atom_vocab, node_dim), atom_feats),
        "atom_vocab": atom_vocab,
        "bond_table": nrm((bond_feats * bond_vocab, edge_dim), bond_feats),
        "bond_vocab": bond_vocab,
        "conv1": conv(node_dim, hidden),
        "conv2": conv(hidden, hidden),
        "conv3": conv(hidden, hidden),
        "w_e_packed": w_e_packed.astype(jnp.bfloat16),   # lin_edge: no bias
        "lin_w": nrm((1, hidden), hidden),               # [1, C] row, f32 (VPU)
        "lin_b": nrm((1, 1), hidden),
    }


if __name__ == "__main__":
    HIDDEN = 32
    N_NODES, N_EDGES, N_GRAPHS = 16, 32, 2
    ATOM_FEATS, ATOM_VOCAB = 9, 16
    BOND_FEATS, BOND_VOCAB = 3, 8

    root = jax.random.PRNGKey(0)
    k_x, k_src, k_dst, k_ea, k_p = jax.random.split(root, 5)

    x = jax.random.randint(k_x, (N_NODES, ATOM_FEATS), 0, ATOM_VOCAB, jnp.int32)
    src = jax.random.randint(k_src, (N_EDGES,), 0, N_NODES, jnp.int32)
    dst = jax.random.randint(k_dst, (N_EDGES,), 0, N_NODES, jnp.int32)
    edge_index = jnp.stack([src, dst], axis=0)                       # [2, E]
    edge_attr = jax.random.randint(k_ea, (N_EDGES, BOND_FEATS), 0, BOND_VOCAB, jnp.int32)
    batch = jnp.concatenate([jnp.zeros(N_NODES // 2, jnp.int32),
                             jnp.ones(N_NODES - N_NODES // 2, jnp.int32)])

    params = init_params(k_p, HIDDEN,
                         atom_feats=ATOM_FEATS, atom_vocab=ATOM_VOCAB,
                         bond_feats=BOND_FEATS, bond_vocab=BOND_VOCAB)

    out = gcn_forward(params, x, edge_index, edge_attr, batch, N_GRAPHS)
    out = jax.block_until_ready(out)
    assert out.shape == (N_GRAPHS, 1)
    print("KERNEL_OK")
</pallas_src>

<mosaic_0001>
module attributes {stable_mosaic.version = 11 : i64} {
  func.func @_gcn_kernel(%arg0: memref<32x2xi32, #tpu.memory_space<vmem>>, %arg1: memref<1x32xi32, #tpu.memory_space<vmem>>, %arg2: memref<1x16xi32, #tpu.memory_space<vmem>>, %arg3: memref<16x128xf32, #tpu.memory_space<vmem>>, %arg4: memref<32x128xf32, #tpu.memory_space<vmem>>, %arg5: memref<128x128xbf16, #tpu.memory_space<vmem>>, %arg6: memref<1x128xf32, #tpu.memory_space<vmem>>, %arg7: memref<32x128xbf16, #tpu.memory_space<vmem>>, %arg8: memref<1x128xf32, #tpu.memory_space<vmem>>, %arg9: memref<32x128xbf16, #tpu.memory_space<vmem>>, %arg10: memref<1x128xf32, #tpu.memory_space<vmem>>, %arg11: memref<128x96xbf16, #tpu.memory_space<vmem>>, %arg12: memref<1x32xf32, #tpu.memory_space<vmem>>, %arg13: memref<1x1xf32, #tpu.memory_space<vmem>>, %arg14: memref<2x1xf32, #tpu.memory_space<vmem>>) attributes {dimension_semantics = [], scalar_prefetch = 0 : i64, scratch_operands = 0 : i64, tpu.core_type = #tpu.core_type<tc>} {
    %c0 = arith.constant 0 : index
    %c0_0 = arith.constant 0 : index
    %0 = vector.load %arg0[%c0, %c0_0] : memref<32x2xi32, #tpu.memory_space<vmem>>, vector<32x1xi32>
    %c0_1 = arith.constant 0 : index
    %c1 = arith.constant 1 : index
    %1 = vector.load %arg0[%c0_1, %c1] : memref<32x2xi32, #tpu.memory_space<vmem>>, vector<32x1xi32>
    %2 = tpu.iota {dimensions = array<i32: 1>} : vector<32x16xi32>
    %3 = vector.broadcast %0 : vector<32x1xi32> to vector<32x16xi32>
    %4 = arith.cmpi eq, %2, %3 : vector<32x16xi32>
    %5 = arith.extui %4 : vector<32x16xi1> to vector<32x16xi32>
    %6 = arith.sitofp %5 : vector<32x16xi32> to vector<32x16xf32>
    %7 = arith.truncf %6 : vector<32x16xf32> to vector<32x16xbf16>
    %8 = vector.broadcast %1 : vector<32x1xi32> to vector<32x16xi32>
    %9 = arith.cmpi eq, %2, %8 : vector<32x16xi32>
    %10 = arith.extui %9 : vector<32x16xi1> to vector<32x16xi32>
    %11 = arith.sitofp %10 : vector<32x16xi32> to vector<32x16xf32>
    %12 = arith.truncf %11 : vector<32x16xf32> to vector<32x16xbf16>
    %13 = tpu.iota {dimensions = array<i32: 0>} : vector<16x32xi32>
    %c0_2 = arith.constant 0 : index
    %c0_3 = arith.constant 0 : index
    %14 = vector.load %arg1[%c0_2, %c0_3] : memref<1x32xi32, #tpu.memory_space<vmem>>, vector<1x32xi32>
    %15 = vector.broadcast %14 : vector<1x32xi32> to vector<16x32xi32>
    %16 = arith.cmpi eq, %13, %15 : vector<16x32xi32>
    %17 = arith.extui %16 : vector<16x32xi1> to vector<16x32xi32>
    %18 = arith.sitofp %17 : vector<16x32xi32> to vector<16x32xf32>
    %c0_4 = arith.constant 0 : index
    %c0_5 = arith.constant 0 : index
    %19 = vector.load %arg4[%c0_4, %c0_5] : memref<32x128xf32, #tpu.memory_space<vmem>>, vector<32x128xf32>
    %20 = arith.truncf %19 : vector<32x128xf32> to vector<32x128xbf16>
    %c0_6 = arith.constant 0 : index
    %c0_7 = arith.constant 0 : index
    %21 = vector.load %arg11[%c0_6, %c0_7] : memref<128x96xbf16, #tpu.memory_space<vmem>>, vector<128x96xbf16>
    %cst = arith.constant dense<0.000000e+00> : vector<32x96xf32>
    %22 = tpu.matmul %20, %21, %cst {dimension_numbers = #tpu.dot_dimension_numbers<[1], [0], [0], [1], [0, 0, 1, 1], [], []>} : vector<32x128xbf16>, vector<128x96xbf16>, vector<32x96xf32> -> vector<32x96xf32>
    %c0_8 = arith.constant 0 : index
    %c0_9 = arith.constant 0 : index
    %23 = vector.load %arg3[%c0_8, %c0_9] : memref<16x128xf32, #tpu.memory_space<vmem>>, vector<16x128xf32>
    %24 = vector.extract_strided_slice %22 {offsets = [0, 0], sizes = [32, 32], strides = [1, 1]} : vector<32x96xf32> to vector<32x32xf32>
    %25 = arith.truncf %23 : vector<16x128xf32> to vector<16x128xbf16>
    %c0_10 = arith.constant 0 : index
    %c0_11 = arith.constant 0 : index
    %26 = vector.load %arg5[%c0_10, %c0_11] : memref<128x128xbf16, #tpu.memory_space<vmem>>, vector<128x128xbf16>
    %cst_12 = arith.constant dense<0.000000e+00> : vector<16x128xf32>
    %27 = tpu.matmul %25, %26, %cst_12 {dimension_numbers = #tpu.dot_dimension_numbers<[1], [0], [0], [1], [0, 0, 1, 1], [], []>} : vector<16x128xbf16>, vector<128x128xbf16>, vector<16x128xf32> -> vector<16x128xf32>
    %c0_13 = arith.constant 0 : index
    %c0_14 = arith.constant 0 : index
    %28 = vector.load %arg6[%c0_13, %c0_14] : memref<1x128xf32, #tpu.memory_space<vmem>>, vector<1x128xf32>
    %29 = vector.broadcast %28 : vector<1x128xf32> to vector<16x128xf32>
    %30 = arith.addf %27, %29 : vector<16x128xf32>
    %31 = vector.extract_strided_slice %30 {offsets = [0, 0], sizes = [16, 32], strides = [1, 1]} : vector<16x128xf32> to vector<16x32xf32>
    %32 = vector.extract_strided_slice %30 {offsets = [0, 32], sizes = [16, 64], strides = [1, 1]} : vector<16x128xf32> to vector<16x64xf32>
    %33 = vector.extract_strided_slice %30 {offsets = [0, 96], sizes = [16, 32], strides = [1, 1]} : vector<16x128xf32> to vector<16x32xf32>
    %34 = arith.truncf %31 : vector<16x32xf32> to vector<16x32xbf16>
    %cst_15 = arith.constant dense<0.000000e+00> : vector<32x32xf32>
    %35 = tpu.matmul %7, %34, %cst_15 {dimension_numbers = #tpu.dot_dimension_numbers<[1], [0], [0], [1], [0, 0, 1, 1], [], []>} : vector<32x16xbf16>, vector<16x32xbf16>, vector<32x32xf32> -> vector<32x32xf32>
    %36 = arith.truncf %32 : vector<16x64xf32> to vector<16x64xbf16>
    %cst_16 = arith.constant dense<0.000000e+00> : vector<32x64xf32>
    %37 = tpu.matmul %12, %36, %cst_16 {dimension_numbers = #tpu.dot_dimension_numbers<[1], [0], [0], [1], [0, 0, 1, 1], [], []>} : vector<32x16xbf16>, vector<16x64xbf16>, vector<32x64xf32> -> vector<32x64xf32>
    %38 = vector.extract_strided_slice %37 {offsets = [0, 0], sizes = [32, 32], strides = [1, 1]} : vector<32x64xf32> to vector<32x32xf32>
    %39 = arith.addf %38, %24 : vector<32x32xf32>
    %40 = vector.extract_strided_slice %37 {offsets = [0, 32], sizes = [32, 32], strides = [1, 1]} : vector<32x64xf32> to vector<32x32xf32>
    %41 = arith.addf %40, %24 : vector<32x32xf32>
    %42 = arith.mulf %35, %39 : vector<32x32xf32>
    %cst_17 = arith.constant dense<0.000000e+00> : vector<32xf32>
    %43 = vector.multi_reduction <add>, %42, %cst_17 [1] : vector<32x32xf32> to vector<32xf32>
    %cst_18 = arith.constant 0.176776692 : f32
    %44 = vector.broadcast %cst_18 : f32 to vector<32xf32>
    %45 = arith.mulf %43, %44 : vector<32xf32>
    %46 = vector.shape_cast %45 : vector<32xf32> to vector<1x32xf32>
    %cst_19 = arith.constant -1.000000e+30 : f32
    %47 = vector.shape_cast %46 : vector<1x32xf32> to vector<1x32xf32>
    %48 = vector.broadcast %47 : vector<1x32xf32> to vector<16x32xf32>
    %49 = vector.broadcast %cst_19 : f32 to vector<16x32xf32>
    %50 = arith.select %16, %48, %49 : vector<16x32xi1>, vector<16x32xf32>
    %cst_20 = arith.constant dense<0xFF800000> : vector<16xf32>
    %51 = vector.multi_reduction <maximumf>, %50, %cst_20 [1] : vector<16x32xf32> to vector<16xf32>
    %52 = vector.shape_cast %51 : vector<16xf32> to vector<16x1xf32>
    %cst_21 = arith.constant -1.000000e+30 : f32
    %53 = vector.shape_cast %52 : vector<16x1xf32> to vector<16x1xf32>
    %54 = vector.broadcast %53 : vector<16x1xf32> to vector<16x32xf32>
    %55 = vector.broadcast %cst_21 : f32 to vector<16x32xf32>
    %56 = arith.select %16, %54, %55 : vector<16x32xi1>, vector<16x32xf32>
    %cst_22 = arith.constant dense<0xFF800000> : vector<32xf32>
    %57 = vector.multi_reduction <maximumf>, %56, %cst_22 [0] : vector<16x32xf32> to vector<32xf32>
    %58 = vector.shape_cast %57 : vector<32xf32> to vector<1x32xf32>
    %59 = arith.subf %46, %58 : vector<1x32xf32>
    %60 = math.exp %59 : vector<1x32xf32>
    %61 = vector.broadcast %60 : vector<1x32xf32> to vector<16x32xf32>
    %62 = arith.mulf %18, %61 : vector<16x32xf32>
    %cst_23 = arith.constant dense<0.000000e+00> : vector<16xf32>
    %63 = vector.multi_reduction <add>, %62, %cst_23 [1] : vector<16x32xf32> to vector<16xf32>
    %64 = vector.shape_cast %63 : vector<16xf32> to vector<16x1xf32>
    %cst_24 = arith.constant 1.000000e-16 : f32
    %65 = vector.broadcast %cst_24 : f32 to vector<16x1xf32>
    %66 = arith.addf %64, %65 : vector<16x1xf32>
    %67 = tpu.reciprocal %66 {approx = true} : vector<16x1xf32> -> vector<16x1xf32>
    %68 = vector.broadcast %67 : vector<16x1xf32> to vector<16x32xf32>
    %69 = arith.mulf %62, %68 : vector<16x32xf32>
    %70 = arith.truncf %69 : vector<16x32xf32> to vector<16x32xbf16>
    %71 = arith.truncf %41 : vector<32x32xf32> to vector<32x32xbf16>
    %cst_25 = arith.constant dense<0.000000e+00> : vector<16x32xf32>
    %72 = tpu.matmul %70, %71, %cst_25 {dimension_numbers = #tpu.dot_dimension_numbers<[1], [0], [0], [1], [0, 0, 1, 1], [], []>} : vector<16x32xbf16>, vector<32x32xbf16>, vector<16x32xf32> -> vector<16x32xf32>
    %73 = arith.addf %72, %33 : vector<16x32xf32>
    %cst_26 = arith.constant 0.000000e+00 : f32
    %74 = vector.broadcast %cst_26 : f32 to vector<16x32xf32>
    %75 = arith.maximumf %73, %74 : vector<16x32xf32>
    %76 = vector.extract_strided_slice %22 {offsets = [0, 32], sizes = [32, 32], strides = [1, 1]} : vector<32x96xf32> to vector<32x32xf32>
    %77 = arith.truncf %75 : vector<16x32xf32> to vector<16x32xbf16>
    %c0_27 = arith.constant 0 : index
    %c0_28 = arith.constant 0 : index
    %78 = vector.load %arg7[%c0_27, %c0_28] : memref<32x128xbf16, #tpu.memory_space<vmem>>, vector<32x128xbf16>
    %cst_29 = arith.constant dense<0.000000e+00> : vector<16x128xf32>
    %79 = tpu.matmul %77, %78, %cst_29 {dimension_numbers = #tpu.dot_dimension_numbers<[1], [0], [0], [1], [0, 0, 1, 1], [], []>} : vector<16x32xbf16>, vector<32x128xbf16>, vector<16x128xf32> -> vector<16x128xf32>
    %c0_30 = arith.constant 0 : index
    %c0_31 = arith.constant 0 : index
    %80 = vector.load %arg8[%c0_30, %c0_31] : memref<1x128xf32, #tpu.memory_space<vmem>>, vector<1x128xf32>
    %81 = vector.broadcast %80 : vector<1x128xf32> to vector<16x128xf32>
    %82 = arith.addf %79, %81 : vector<16x128xf32>
    %83 = vector.extract_strided_slice %82 {offsets = [0, 0], sizes = [16, 32], strides = [1, 1]} : vector<16x128xf32> to vector<16x32xf32>
    %84 = vector.extract_strided_slice %82 {offsets = [0, 32], sizes = [16, 64], strides = [1, 1]} : vector<16x128xf32> to vector<16x64xf32>
    %85 = vector.extract_strided_slice %82 {offsets = [0, 96], sizes = [16, 32], strides = [1, 1]} : vector<16x128xf32> to vector<16x32xf32>
    %86 = arith.truncf %83 : vector<16x32xf32> to vector<16x32xbf16>
    %cst_32 = arith.constant dense<0.000000e+00> : vector<32x32xf32>
    %87 = tpu.matmul %7, %86, %cst_32 {dimension_numbers = #tpu.dot_dimension_numbers<[1], [0], [0], [1], [0, 0, 1, 1], [], []>} : vector<32x16xbf16>, vector<16x32xbf16>, vector<32x32xf32> -> vector<32x32xf32>
    %88 = arith.truncf %84 : vector<16x64xf32> to vector<16x64xbf16>
    %cst_33 = arith.constant dense<0.000000e+00> : vector<32x64xf32>
    %89 = tpu.matmul %12, %88, %cst_33 {dimension_numbers = #tpu.dot_dimension_numbers<[1], [0], [0], [1], [0, 0, 1, 1], [], []>} : vector<32x16xbf16>, vector<16x64xbf16>, vector<32x64xf32> -> vector<32x64xf32>
    %90 = vector.extract_strided_slice %89 {offsets = [0, 0], sizes = [32, 32], strides = [1, 1]} : vector<32x64xf32> to vector<32x32xf32>
    %91 = arith.addf %90, %76 : vector<32x32xf32>
    %92 = vector.extract_strided_slice %89 {offsets = [0, 32], sizes = [32, 32], strides = [1, 1]} : vector<32x64xf32> to vector<32x32xf32>
    %93 = arith.addf %92, %76 : vector<32x32xf32>
    %94 = arith.mulf %87, %91 : vector<32x32xf32>
    %cst_34 = arith.constant dense<0.000000e+00> : vector<32xf32>
    %95 = vector.multi_reduction <add>, %94, %cst_34 [1] : vector<32x32xf32> to vector<32xf32>
    %cst_35 = arith.constant 0.176776692 : f32
    %96 = vector.broadcast %cst_35 : f32 to vector<32xf32>
    %97 = arith.mulf %95, %96 : vector<32xf32>
    %98 = vector.shape_cast %97 : vector<32xf32> to vector<1x32xf32>
    %cst_36 = arith.constant -1.000000e+30 : f32
    %99 = vector.shape_cast %98 : vector<1x32xf32> to vector<1x32xf32>
    %100 = vector.broadcast %99 : vector<1x32xf32> to vector<16x32xf32>
    %101 = vector.broadcast %cst_36 : f32 to vector<16x32xf32>
    %102 = arith.select %16, %100, %101 : vector<16x32xi1>, vector<16x32xf32>
    %cst_37 = arith.constant dense<0xFF800000> : vector<16xf32>
    %103 = vector.multi_reduction <maximumf>, %102, %cst_37 [1] : vector<16x32xf32> to vector<16xf32>
    %104 = vector.shape_cast %103 : vector<16xf32> to vector<16x1xf32>
    %cst_38 = arith.constant -1.000000e+30 : f32
    %105 = vector.shape_cast %104 : vector<16x1xf32> to vector<16x1xf32>
    %106 = vector.broadcast %105 : vector<16x1xf32> to vector<16x32xf32>
    %107 = vector.broadcast %cst_38 : f32 to vector<16x32xf32>
    %108 = arith.select %16, %106, %107 : vector<16x32xi1>, vector<16x32xf32>
    %cst_39 = arith.constant dense<0xFF800000> : vector<32xf32>
    %109 = vector.multi_reduction <maximumf>, %108, %cst_39 [0] : vector<16x32xf32> to vector<32xf32>
    %110 = vector.shape_cast %109 : vector<32xf32> to vector<1x32xf32>
    %111 = arith.subf %98, %110 : vector<1x32xf32>
    %112 = math.exp %111 : vector<1x32xf32>
    %113 = vector.broadcast %112 : vector<1x32xf32> to vector<16x32xf32>
    %114 = arith.mulf %18, %113 : vector<16x32xf32>
    %cst_40 = arith.constant dense<0.000000e+00> : vector<16xf32>
    %115 = vector.multi_reduction <add>, %114, %cst_40 [1] : vector<16x32xf32> to vector<16xf32>
    %116 = vector.shape_cast %115 : vector<16xf32> to vector<16x1xf32>
    %cst_41 = arith.constant 1.000000e-16 : f32
    %117 = vector.broadcast %cst_41 : f32 to vector<16x1xf32>
    %118 = arith.addf %116, %117 : vector<16x1xf32>
    %119 = tpu.reciprocal %118 {approx = true} : vector<16x1xf32> -> vector<16x1xf32>
    %120 = vector.broadcast %119 : vector<16x1xf32> to vector<16x32xf32>
    %121 = arith.mulf %114, %120 : vector<16x32xf32>
    %122 = arith.truncf %121 : vector<16x32xf32> to vector<16x32xbf16>
    %123 = arith.truncf %93 : vector<32x32xf32> to vector<32x32xbf16>
    %cst_42 = arith.constant dense<0.000000e+00> : vector<16x32xf32>
    %124 = tpu.matmul %122, %123, %cst_42 {dimension_numbers = #tpu.dot_dimension_numbers<[1], [0], [0], [1], [0, 0, 1, 1], [], []>} : vector<16x32xbf16>, vector<32x32xbf16>, vector<16x32xf32> -> vector<16x32xf32>
    %125 = arith.addf %124, %85 : vector<16x32xf32>
    %cst_43 = arith.constant 0.000000e+00 : f32
    %126 = vector.broadcast %cst_43 : f32 to vector<16x32xf32>
    %127 = arith.maximumf %125, %126 : vector<16x32xf32>
    %128 = vector.extract_strided_slice %22 {offsets = [0, 64], sizes = [32, 32], strides = [1, 1]} : vector<32x96xf32> to vector<32x32xf32>
    %129 = arith.truncf %127 : vector<16x32xf32> to vector<16x32xbf16>
    %c0_44 = arith.constant 0 : index
    %c0_45 = arith.constant 0 : index
    %130 = vector.load %arg9[%c0_44, %c0_45] : memref<32x128xbf16, #tpu.memory_space<vmem>>, vector<32x128xbf16>
    %cst_46 = arith.constant dense<0.000000e+00> : vector<16x128xf32>
    %131 = tpu.matmul %129, %130, %cst_46 {dimension_numbers = #tpu.dot_dimension_numbers<[1], [0], [0], [1], [0, 0, 1, 1], [], []>} : vector<16x32xbf16>, vector<32x128xbf16>, vector<16x128xf32> -> vector<16x128xf32>
    %c0_47 = arith.constant 0 : index
    %c0_48 = arith.constant 0 : index
    %132 = vector.load %arg10[%c0_47, %c0_48] : memref<1x128xf32, #tpu.memory_space<vmem>>, vector<1x128xf32>
    %133 = vector.broadcast %132 : vector<1x128xf32> to vector<16x128xf32>
    %134 = arith.addf %131, %133 : vector<16x128xf32>
    %135 = vector.extract_strided_slice %134 {offsets = [0, 0], sizes = [16, 32], strides = [1, 1]} : vector<16x128xf32> to vector<16x32xf32>
    %136 = vector.extract_strided_slice %134 {offsets = [0, 32], sizes = [16, 64], strides = [1, 1]} : vector<16x128xf32> to vector<16x64xf32>
    %137 = vector.extract_strided_slice %134 {offsets = [0, 96], sizes = [16, 32], strides = [1, 1]} : vector<16x128xf32> to vector<16x32xf32>
    %138 = arith.truncf %135 : vector<16x32xf32> to vector<16x32xbf16>
    %cst_49 = arith.constant dense<0.000000e+00> : vector<32x32xf32>
    %139 = tpu.matmul %7, %138, %cst_49 {dimension_numbers = #tpu.dot_dimension_numbers<[1], [0], [0], [1], [0, 0, 1, 1], [], []>} : vector<32x16xbf16>, vector<16x32xbf16>, vector<32x32xf32> -> vector<32x32xf32>
    %140 = arith.truncf %136 : vector<16x64xf32> to vector<16x64xbf16>
    %cst_50 = arith.constant dense<0.000000e+00> : vector<32x64xf32>
    %141 = tpu.matmul %12, %140, %cst_50 {dimension_numbers = #tpu.dot_dimension_numbers<[1], [0], [0], [1], [0, 0, 1, 1], [], []>} : vector<32x16xbf16>, vector<16x64xbf16>, vector<32x64xf32> -> vector<32x64xf32>
    %142 = vector.extract_strided_slice %141 {offsets = [0, 0], sizes = [32, 32], strides = [1, 1]} : vector<32x64xf32> to vector<32x32xf32>
    %143 = arith.addf %142, %128 : vector<32x32xf32>
    %144 = vector.extract_strided_slice %141 {offsets = [0, 32], sizes = [32, 32], strides = [1, 1]} : vector<32x64xf32> to vector<32x32xf32>
    %145 = arith.addf %144, %128 : vector<32x32xf32>
    %146 = arith.mulf %139, %143 : vector<32x32xf32>
    %cst_51 = arith.constant dense<0.000000e+00> : vector<32xf32>
    %147 = vector.multi_reduction <add>, %146, %cst_51 [1] : vector<32x32xf32> to vector<32xf32>
    %cst_52 = arith.constant 0.176776692 : f32
    %148 = vector.broadcast %cst_52 : f32 to vector<32xf32>
    %149 = arith.mulf %147, %148 : vector<32xf32>
    %150 = vector.shape_cast %149 : vector<32xf32> to vector<1x32xf32>
    %cst_53 = arith.constant -1.000000e+30 : f32
    %151 = vector.shape_cast %150 : vector<1x32xf32> to vector<1x32xf32>
    %152 = vector.broadcast %151 : vector<1x32xf32> to vector<16x32xf32>
    %153 = vector.broadcast %cst_53 : f32 to vector<16x32xf32>
    %154 = arith.select %16, %152, %153 : vector<16x32xi1>, vector<16x32xf32>
    %cst_54 = arith.constant dense<0xFF800000> : vector<16xf32>
    %155 = vector.multi_reduction <maximumf>, %154, %cst_54 [1] : vector<16x32xf32> to vector<16xf32>
    %156 = vector.shape_cast %155 : vector<16xf32> to vector<16x1xf32>
    %cst_55 = arith.constant -1.000000e+30 : f32
    %157 = vector.shape_cast %156 : vector<16x1xf32> to vector<16x1xf32>
    %158 = vector.broadcast %157 : vector<16x1xf32> to vector<16x32xf32>
    %159 = vector.broadcast %cst_55 : f32 to vector<16x32xf32>
    %160 = arith.select %16, %158, %159 : vector<16x32xi1>, vector<16x32xf32>
    %cst_56 = arith.constant dense<0xFF800000> : vector<32xf32>
    %161 = vector.multi_reduction <maximumf>, %160, %cst_56 [0] : vector<16x32xf32> to vector<32xf32>
    %162 = vector.shape_cast %161 : vector<32xf32> to vector<1x32xf32>
    %163 = arith.subf %150, %162 : vector<1x32xf32>
    %164 = math.exp %163 : vector<1x32xf32>
    %165 = vector.broadcast %164 : vector<1x32xf32> to vector<16x32xf32>
    %166 = arith.mulf %18, %165 : vector<16x32xf32>
    %cst_57 = arith.constant dense<0.000000e+00> : vector<16xf32>
    %167 = vector.multi_reduction <add>, %166, %cst_57 [1] : vector<16x32xf32> to vector<16xf32>
    %168 = vector.shape_cast %167 : vector<16xf32> to vector<16x1xf32>
    %cst_58 = arith.constant 1.000000e-16 : f32
    %169 = vector.broadcast %cst_58 : f32 to vector<16x1xf32>
    %170 = arith.addf %168, %169 : vector<16x1xf32>
    %171 = tpu.reciprocal %170 {approx = true} : vector<16x1xf32> -> vector<16x1xf32>
    %172 = vector.broadcast %171 : vector<16x1xf32> to vector<16x32xf32>
    %173 = arith.mulf %166, %172 : vector<16x32xf32>
    %174 = arith.truncf %173 : vector<16x32xf32> to vector<16x32xbf16>
    %175 = arith.truncf %145 : vector<32x32xf32> to vector<32x32xbf16>
    %cst_59 = arith.constant dense<0.000000e+00> : vector<16x32xf32>
    %176 = tpu.matmul %174, %175, %cst_59 {dimension_numbers = #tpu.dot_dimension_numbers<[1], [0], [0], [1], [0, 0, 1, 1], [], []>} : vector<16x32xbf16>, vector<32x32xbf16>, vector<16x32xf32> -> vector<16x32xf32>
    %177 = arith.addf %176, %137 : vector<16x32xf32>
    %178 = tpu.iota {dimensions = array<i32: 0>} : vector<2x16xi32>
    %c0_60 = arith.constant 0 : index
    %c0_61 = arith.constant 0 : index
    %179 = vector.load %arg2[%c0_60, %c0_61] : memref<1x16xi32, #tpu.memory_space<vmem>>, vector<1x16xi32>
    %180 = vector.broadcast %179 : vector<1x16xi32> to vector<2x16xi32>
    %181 = arith.cmpi eq, %178, %180 : vector<2x16xi32>
    %182 = arith.extui %181 : vector<2x16xi1> to vector<2x16xi32>
    %183 = arith.sitofp %182 : vector<2x16xi32> to vector<2x16xf32>
    %184 = arith.truncf %183 : vector<2x16xf32> to vector<2x16xbf16>
    %185 = arith.truncf %177 : vector<16x32xf32> to vector<16x32xbf16>
    %cst_62 = arith.constant dense<0.000000e+00> : vector<2x32xf32>
    %186 = tpu.matmul %184, %185, %cst_62 {dimension_numbers = #tpu.dot_dimension_numbers<[1], [0], [0], [1], [0, 0, 1, 1], [], []>} : vector<2x16xbf16>, vector<16x32xbf16>, vector<2x32xf32> -> vector<2x32xf32>
    %cst_63 = arith.constant dense<0.000000e+00> : vector<2xf32>
    %187 = vector.multi_reduction <add>, %183, %cst_63 [1] : vector<2x16xf32> to vector<2xf32>
    %188 = vector.shape_cast %187 : vector<2xf32> to vector<2x1xf32>
    %cst_64 = arith.constant 1.000000e+00 : f32
    %189 = vector.broadcast %cst_64 : f32 to vector<2x1xf32>
    %190 = arith.maximumf %188, %189 : vector<2x1xf32>
    %191 = vector.broadcast %190 : vector<2x1xf32> to vector<2x32xf32>
    %192 = arith.divf %186, %191 : vector<2x32xf32>
    %c0_65 = arith.constant 0 : index
    %c0_66 = arith.constant 0 : index
    %193 = vector.load %arg12[%c0_65, %c0_66] : memref<1x32xf32, #tpu.memory_space<vmem>>, vector<1x32xf32>
    %194 = vector.broadcast %193 : vector<1x32xf32> to vector<2x32xf32>
    %195 = arith.mulf %192, %194 : vector<2x32xf32>
    %cst_67 = arith.constant dense<0.000000e+00> : vector<2xf32>
    %196 = vector.multi_reduction <add>, %195, %cst_67 [1] : vector<2x32xf32> to vector<2xf32>
    %197 = vector.shape_cast %196 : vector<2xf32> to vector<2x1xf32>
    %c0_68 = arith.constant 0 : index
    %c0_69 = arith.constant 0 : index
    %198 = vector.load %arg13[%c0_68, %c0_69] : memref<1x1xf32, #tpu.memory_space<vmem>>, vector<1x1xf32>
    %199 = vector.broadcast %198 : vector<1x1xf32> to vector<2x1xf32>
    %200 = arith.addf %197, %199 : vector<2x1xf32>
    %c0_70 = arith.constant 0 : index
    %c0_71 = arith.constant 0 : index
    %201 = vector.load %arg14[%c0_70, %c0_71] : memref<2x1xf32, #tpu.memory_space<vmem>>, vector<2x1xf32>
    tpu.vector_store %arg14[%c0_70, %c0_71], %200 {strides = array<i32>} : memref<2x1xf32, #tpu.memory_space<vmem>>, vector<2x1xf32>,
    return
  }
}

</mosaic_0001>

<bundles_post_ra>
// kernel: tpu_custom_call.1
= control target key start
LH: loop header
LB: loop body
LE: loop exit
PB: predicated region body
PF: predicated region fallthrough
CT: control target
= control target key end

     0   :  { %s2569_s0 = inlined_call_operand.vmem [shape: s32[32,2], index: 0, kind: input, shape index: {}]   ;;  %s2570_s1 = inlined_call_operand.vmem [shape: s32[1,32], index: 1, kind: input, shape index: {}]   ;;  %s2571_s2 = inlined_call_operand.vmem [shape: s32[1,16], index: 2, kind: input, shape index: {}]   ;;  %s2572_s3 = inlined_call_operand.vmem [shape: f32[16,128], index: 3, kind: input, shape index: {}]   ;;  %s2573_s4 = inlined_call_operand.vmem [shape: f32[32,128], index: 4, kind: input, shape index: {}]   ;;  %s2574_s5 = inlined_call_operand.vmem [shape: bf16[128,128], index: 5, kind: input, shape index: {}]   ;;  %s2575_s6 = inlined_call_operand.vmem [shape: f32[1,128], index: 6, kind: input, shape index: {}]   ;;  %s2576_s7 = inlined_call_operand.vmem [shape: bf16[32,128], index: 7, kind: input, shape index: {}]   ;;  %s2577_s8 = inlined_call_operand.vmem [shape: f32[1,128], index: 8, kind: input, shape index: {}]   ;;  %s2578_s9 = inlined_call_operand.hbm [shape: bf16[32,128], index: 9, kind: input, shape index: {}]   ;;  %s2579_s10 = inlined_call_operand.vmem [shape: f32[1,128], index: 10, kind: input, shape index: {}]   ;;  %s2580_s11 = inlined_call_operand.vmem [shape: bf16[128,96], index: 11, kind: input, shape index: {}]   ;;  %s2581_s12 = inlined_call_operand.vmem [shape: f32[1,32], index: 12, kind: input, shape index: {}]   ;;  %s2582_s13 = inlined_call_operand.<no memory space> [shape: f32[1,1], index: 13, kind: input, shape index: {}]   ;;  %s2583_s14 = inlined_call_operand.vmem [shape: f32[2,1], index: 14, kind: output, shape index: {}]  }
   0x1   :  { %v19_v0 = vstv %s2582_s13 }
   0x2   :  { %20 = vst [vmem:[#allocation2] sm:$0x1] %v19_v0 }
   0x3   :  { %21 = vsyncpa [#allocation4], 0  ;;  %s1983_s15 = smov [#allocation3]   ;;  %s1959_s19 = scalar_lea.hbm %s2578_s9, 256 }
   0x4   :  { %s45_s16 = sshll.u32 %s1983_s15, 4  ;;  %p1960_p0 = scmp.ne.s32.totalorder %s2578_s9, %s1959_s19  ;;  %s46_s16 = int_to_ptr.vmem [resolvable:$true] %s45_s16 }
   0x5   :  { %p1963_p1 = scmp.lt.u32.totalorder %s1959_s19, %s2578_s9 }
   0x7   :  { %p1965_p2 = pnand %p1963_p1, %p1960_p0 }
   0x9   :  { %1968 = shalt.err (!%p1965_p2)
}
   0xa   :  { %s1969_s13 = scalar_lea.vmem %s46_s16, 256  ;;  %p1974_p4 = scmp.lt.s32.totalorder %s46_s16, %s46_s16 }
   0xb   :  { %p1970_p3 = scmp.ne.s32.totalorder %s46_s16, %s1969_s13  ;;  %p1975_p5 = scmp.lt.s32.totalorder %s1969_s13, %s1969_s13 }
   0xd   :  { %p1976_p6 = por %p1975_p5, %p1974_p4 }
   0xf   :  { %p1977_p7 = pnand %p1976_p6, %p1970_p3 }
  0x11   :  { %1980 = shalt.err (!%p1977_p7)
}
  0x12   :  { %s1984_s24 = smov 64   ;;  %s1985_s25 = smov 4  }
  0x13   :  { %51 = dma.hbm_to_vmem [thread:$0]  %s2578_s9, 256, %s46_s16, [#allocation4], %s1984_s24, %s1984_s24, %s1985_s25  }
  0x14   :  { %1981 = dma.done.wait [#allocation4], 256  }
  0x15   :  { %1982 = vsyncadd [#allocation4], 4294967040  ;;  %v1986_v1 = vmov 0.0   ;;  %vm1987_vm0 = vmmov 0   ;;  %v1988_v2 = vmov 1   ;;  %v1901_v3 = vld [vmem:[%s2574_s5] sm:$0xff]   ;;  %v68_v33 = vlaneseq }
  0x16   :  { %1786 = vmatprep.subr.bf16.mxu1 %v1986_v1  ;;  %1802 = vmatprep.mubr.msk.bf16.mxu1 %vm1987_vm0, %v1986_v1  ;;  %v1902_v4 = vld [vmem:[%s2574_s5 + $0x8] sm:$0xff]   ;;  %v1903_v5 = vld [vmem:[%s2574_s5 + $0x10] sm:$0xff]   ;;  %v1904_v6 = vld [vmem:[%s2574_s5 + $0x18] sm:$0xff]   ;;  %v1989_v16 = vmov 0   ;;  %vm371_vm5 = vcmask 130048   ;;  %vm514_vm10 = vcmask 261120  }
  0x17   :  { %1898 = vset.pattern.permute.xlu1 %v1988_v2  ;;  %1897 = vset.pattern.permute.xlu0 %v1988_v2  ;;  %v66_v7 = vld [vmem:[%s2569_s0 + $0x10] sm:$0xff]  ;;  %v64_v8 = vld [vmem:[%s2569_s0] sm:$0xff]  ;;  %v67_v9 = vld [vmem:[%s2569_s0 + $0x18] sm:$0xff]  ;;  %v2173_v34 = vand.u32 127, %v68_v33  ;;  %vm544_vm11 = vcmask 130112   ;;  %vm551_vm12 = vcmask 195712  }
  0x18   :  { %1787 = vmatpush3.bf16.msra.mxu1 %v1901_v3  ;;  %103 = vperm.xlu1 %1898, %v66_v7   ;;  %v65_v10 = vld [vmem:[%s2569_s0 + $0x8] sm:$0xff]  ;;  %v1909_v11 = vld [vmem:[%s2580_s11] sm:$0xff]   ;;  %v1911_v15 = vld [vmem:[%s2580_s11 + $0x10] sm:$0xff]   ;;  %vm558_vm13 = vcmask 261312  }
  0x19   :  { %1788 = vmatprep.subr.bf16.mxu1 %v1986_v1  ;;  %97 = vperm.xlu0 %1897, %v64_v8   ;;  %v1910_v12 = vld [vmem:[%s2580_s11 + $0x8] sm:$0xff]   ;;  %v1905_v13 = vld [vmem:[%s2574_s5 + $0x20] sm:$0xff]   ;;  %v1912_v17 = vld [vmem:[%s2580_s11 + $0x18] sm:$0xff]  }
  0x1a   :  { %1766 = vmatprep.subr.bf16.mxu0 %v1909_v11  ;;  %v1906_v14 = vld [vmem:[%s2574_s5 + $0x28] sm:$0xff]   ;;  %v1907_v18 = vld [vmem:[%s2574_s5 + $0x30] sm:$0xff]   ;;  %v1913_v19 = vld [vmem:[%s2580_s11 + $0x20] sm:$0xff]  }
  0x1b   :  { %1767 = vmatpush3.bf16.msra.mxu0 %v1909_v11  ;;  %v1908_v20 = vld [vmem:[%s2574_s5 + $0x38] sm:$0xff]   ;;  %v255_v21 = vld [vmem:[%s2572_s3] sm:$0xff]  ;;  %v256_v22 = vld [vmem:[%s2572_s3 + $0x8] sm:$0xff] }
  0x1c   :  { %1789 = vmatpush3.bf16.msra.mxu1 %v1902_v4  ;;  %106 = vperm.xlu1 %1898, %v67_v9   ;;  %v1914_v23 = vld [vmem:[%s2580_s11 + $0x28] sm:$0xff]   ;;  %v257_v24 = vpack.c.bf16 %v256_v22, %v255_v21  ;;  %v1915_v25 = vld [vmem:[%s2580_s11 + $0x30] sm:$0xff]   ;;  %v1916_v26 = vld [vmem:[%s2580_s11 + $0x38] sm:$0xff]  }
  0x1d   :  { %1790 = vmatprep.subr.bf16.mxu1 %v1986_v1  ;;  %100 = vperm.xlu0 %1897, %v65_v10   ;;  %v136_v27 = vld [vmem:[%s2573_s4] sm:$0xff]  ;;  %v137_v28 = vld [vmem:[%s2573_s4 + $0x8] sm:$0xff]  ;;  %v138_v30 = vld [vmem:[%s2573_s4 + $0x10] sm:$0xff] }
  0x1e   :  { %1768 = vmatprep.subr.bf16.mxu0 %v1910_v12  ;;  %v140_v29 = vpack.c.bf16 %v137_v28, %v136_v27  ;;  %v139_v31 = vld [vmem:[%s2573_s4 + $0x18] sm:$0xff]  ;;  %v1675_v52 = vld [vmem:[%s2575_s6] ss:$0 sm:$0xff]  ;;  %s1990_s6 = smov 96   ;;  %v546_v28 = vadd.s32 4294967280, %v2173_v34 }
  0x1f   :  { %1769 = vmatpush3.bf16.msra.mxu0 %v1910_v12  ;;  %v141_v32 = vpack.c.bf16 %v139_v31, %v138_v30 }
  0x20   :  { %1791 = vmatpush3.bf16.msra.mxu1 %v1903_v5  ;;  %1900 = vset.pattern.permute.xlu1 %v1989_v16 }
  0x21   :  { %1792 = vmatprep.subr.bf16.mxu1 %v1986_v1  ;;  %1899 = vset.pattern.permute.xlu0 %v1989_v16 }
  0x22   :  { %74 = vperm.xlu1 %1900, %v65_v10   ;;  %71 = vperm.xlu0 %1899, %v64_v8  }
  0x23   :  { %1770 = vmatprep.subr.bf16.mxu0 %v1911_v15  ;;  %1782 = vmatprep.mubr.bf16.mxu0 %v140_v29 }
  0x24   :  { %1793 = vmatpush3.bf16.msra.mxu1 %v1904_v6  ;;  %1771 = vmatpush3.bf16.msra.mxu0 %v1911_v15 }
  0x25   :  { %1794 = vmatprep.subr.bf16.mxu1 %v1986_v1  ;;  %1772 = vmatprep.subr.bf16.mxu0 %v1912_v17 }
  0x26   :  { %77 = vperm.xlu1 %1900, %v66_v7   ;;  %80 = vperm.xlu0 %1899, %v67_v9  }
  0x28   :  { %1795 = vmatpush3.bf16.msra.mxu1 %v1905_v13  ;;  %1773 = vmatpush3.bf16.msra.mxu0 %v1912_v17 }
  0x29   :  { %1796 = vmatprep.subr.bf16.mxu1 %v1986_v1  ;;  %1774 = vmatprep.subr.bf16.mxu0 %v1913_v19 }
  0x2c   :  { %1797 = vmatpush3.bf16.msra.mxu1 %v1906_v14  ;;  %1775 = vmatpush3.bf16.msra.mxu0 %v1913_v19 }
  0x2d   :  { %1798 = vmatprep.subr.bf16.mxu1 %v1986_v1  ;;  %1776 = vmatprep.subr.bf16.mxu0 %v1914_v23 }
  0x30   :  { %1799 = vmatpush3.bf16.msra.mxu1 %v1907_v18  ;;  %1777 = vmatpush3.bf16.msra.mxu0 %v1914_v23 }
  0x31   :  { %1800 = vmatprep.subr.bf16.mxu1 %v1986_v1  ;;  %1778 = vmatprep.subr.bf16.mxu0 %v1915_v25 }
  0x34   :  { %1801 = vmatpush3.bf16.msra.mxu1 %v1908_v20  ;;  %1779 = vmatpush3.bf16.msra.mxu0 %v1915_v25  ;;  %v539_v25 = vadd.s32 4294967288, %v2173_v34 }
  0x35   :  { %1780 = vmatprep.subr.bf16.mxu0 %v1916_v26 }
  0x37   :  { %1803 = vmatmul.mubr.bf16.vlgmr.msra.gmra.mrb[0].mxu1 %v257_v24 }
  0x38   :  { %1781 = vmatpush3.bf16.msra.mxu0 %v1916_v26  ;;  %v2253_v26 = vshrl.u32 %v68_v33, 7 }
  0x3a   :  { %v2257_v29 = vsub.s32 %v539_v25, %v2253_v26  ;;  %v2261_v31 = vsub.s32 %v2173_v34, %v2253_v26 }
  0x3b   :  { %1783 = vmatmul.mubr.bf16.vlgmr.msra.gmra.mrb[0].mxu0 %v141_v32 }
  0x97   :  { %v104_v35 = vpop.permute.xlu1 %103 }
  0x98   :  { %vm110_vm1 = vcmp.eq.s32.totalorder %v2173_v34, %v104_v35  ;;  %v98_v36 = vpop.permute.xlu0 %97 }
  0x99   :  { %vm108_vm2 = vcmp.eq.s32.totalorder %v2173_v34, %v98_v36  ;;  %v1662_v37 = vsel %vm110_vm1, 1.0, %v1986_v1  ;;  %v553_v36 = vadd.s32 4294967272, %v2173_v34  ;;  %vm1622_vm1 = vcmask 123904  }
  0x9a   :  { %v1660_v39 = vsel %vm108_vm2, 1.0, %v1986_v1  ;;  %vm1637_vm2 = vcmask 254976  }
  0x9b   :  { %v107_v38 = vpop.permute.xlu1 %106 }
  0x9c   :  { %vm111_vm3 = vcmp.eq.s32.totalorder %v2173_v34, %v107_v38  ;;  %v101_v40 = vpop.permute.xlu0 %100 }
  0x9d   :  { %v1663_v41 = vsel %vm111_vm3, 1.0, %v1986_v1  ;;  %vm109_vm4 = vcmp.eq.s32.totalorder %v2173_v34, %v101_v40  ;;  %vm1649_vm3 = vcmask 1024  }
  0x9e   :  { %v2182_v42 = vpack.c.bf16 %v1663_v41, %v1662_v37  ;;  %v1661_v43 = vsel %vm109_vm4, 1.0, %v1986_v1  ;;  %v2265_v37 = vsub.s32 %v546_v28, %v2253_v26  ;;  %v2270_v41 = vsub.s32 %v553_v36, %v2253_v26 }
  0x9f   :  { %v2185_v44 = vpack.c.bf16 %v1661_v43, %v1660_v39  ;;  %v124_v43 = vadd.s32 8, %v2253_v26 }
  0xa1   :  { %v75_v45 = vpop.permute.xlu1 %74  ;;  %1814 = vmatprep.mubr.msk.bf16.mxu1 %vm371_vm5, %v2185_v44  ;;  %v72_v46 = vpop.permute.xlu0 %71 }
  0xa2   :  { %vm83_vm6 = vcmp.eq.s32.totalorder %v2173_v34, %v75_v45  ;;  %vm82_vm7 = vcmp.eq.s32.totalorder %v2173_v34, %v72_v46 }
  0xa3   :  { %v1657_v47 = vsel %vm83_vm6, 1.0, %v1986_v1  ;;  %v1656_v48 = vsel %vm82_vm7, 1.0, %v1986_v1 }
  0xa4   :  { %v2193_v49 = vpack.c.bf16 %v1657_v47, %v1656_v48 }
  0xa5   :  { %v78_v50 = vpop.permute.xlu1 %77  ;;  %v81_v51 = vpop.permute.xlu0 %80 }
  0xa6   :  { %1808 = vmatprep.mubr.msk.bf16.mxu0 %vm371_vm5, %v2193_v49  ;;  %vm84_vm8 = vcmp.eq.s32.totalorder %v2173_v34, %v78_v50  ;;  %vm85_vm9 = vcmp.eq.s32.totalorder %v2173_v34, %v81_v51  ;;  %v1664_v34 = vld [vmem:[%s2570_s1] ss:$0 sm:$0xff]  ;;  %s1991_s1 = smov 32  }
  0xa7   :  { %v1658_v59 = vsel %vm84_vm8, 1.0, %v1986_v1  ;;  %v1659_v60 = vsel %vm85_vm9, 1.0, %v1986_v1  ;;  %vm2279_vm14 = vcmp.eq.s32.totalorder %v124_v43, %v1664_v34  ;;  %vm2284_vm15 = vcmp.eq.s32.totalorder %v2253_v26, %v1664_v34 }
  0xa8   :  { %v2211_v62 = vpack.c.bf16 %v1659_v60, %v1658_v59 }
 0x10a   :  { %v363_v53 = vpop.f32.mrb[0].mxu1 }
 0x10b   :  { %v1804_v54 = vpop.f32.mrb[1].mxu1  ;;  %v2202_v56 = vadd.f32 %v1675_v52, %v363_v53 }
 0x10c   :  { %v366_v55 = vpop.f32.mrb[2].mxu1 }
 0x10d   :  { %v2204_v57 = vadd.f32 %v1675_v52, %v366_v55  ;;  %v1805_v58 = vpop.f32.mrb[3].mxu1 }
 0x10e   :  { %v2218_v63 = vpop.f32.mrb[0].mxu0 }
 0x10f   :  { %v370_v61 = vpack.c.bf16 %v2204_v57, %v2202_v56  ;;  %v2220_v0 = vpop.f32.mrb[1].mxu0 }
 0x110   :  { %v2222_v2 = vpop.f32.mrb[2].mxu0 }
 0x111   :  { %1806 = vmatprep.subr.bf16.mxu0 %v370_v61  ;;  %428 = vrot.lane.b32.xlu1 %v370_v61, %s1990_s6  ;;  %v2224_v3 = vpop.f32.mrb[3].mxu0 }
 0x112   :  { %1807 = vmatpush3.bf16.msra.mxu0 %v370_v61 }
 0x113   :  { %1818 = vmatprep.subr.bf16.mxu0 %v1986_v1 }
 0x115   :  { %1809 = vmatmul.mubr.msk.bf16.vlgmr.msra.gmra.mrb[4].mxu0 %vm371_vm5, %v2211_v62 }
 0x116   :  { %1822 = vmatprep.mubr.msk.bf16.mxu0 %vm1987_vm0, %v1986_v1 }
 0x183   :  { %v429_v4 = vpop.permute.xlu1 %428 }
 0x184   :  { %1812 = vmatprep.subr.bf16.mxu1 %v429_v4 }
 0x185   :  { %1813 = vmatpush3.bf16.msra.mxu1 %v429_v4 }
 0x186   :  { %1826 = vmatprep.subr.bf16.mxu1 %v1986_v1 }
 0x188   :  { %1815 = vmatmul.mubr.msk.bf16.vlgmr.msra.gmra.mrb[4].mxu1 %vm371_vm5, %v2182_v42 }
 0x189   :  { %1830 = vmatprep.mubr.msk.bf16.mxu1 %vm1987_vm0, %v1986_v1 }
 0x1e8   :  { %v1810_v5 = vpop.f32.mrb[4].mxu0 }
 0x1e9   :  { %v412_v6 = vpop.f32.mrb[5].mxu0 }
 0x1ea   :  { %v1811_v7 = vpop.f32.mrb[6].mxu0 }
 0x1eb   :  { %v415_v8 = vpop.f32.mrb[7].mxu0 }
 0x25b   :  { %v2231_v9 = vpop.f32.mrb[4].mxu1 }
 0x25c   :  { %v488_v10 = vadd.f32 %v2231_v9, %v2218_v63  ;;  %v2235_v11 = vpop.f32.mrb[5].mxu1 }
 0x25d   :  { %v486_v12 = vadd.f32 %v2235_v11, %v2220_v0  ;;  %v2239_v13 = vpop.f32.mrb[6].mxu1 }
 0x25e   :  { %v489_v14 = vadd.f32 %v2239_v13, %v2222_v2  ;;  %v2243_v15 = vpop.f32.mrb[7].mxu1  ;;  %v512_v16 = vmul.f32 %v1810_v5, %v488_v10 }
 0x25f   :  { %v487_v17 = vadd.f32 %v2243_v15, %v2224_v3  ;;  %v510_v18 = vmul.f32 %v486_v12, %v412_v6 }
 0x260   :  { %v513_v19 = vmul.f32 %v1811_v7, %v489_v14  ;;  %v521_v23 = vsel %vm514_vm10, %v512_v16, 0.0 }
 0x261   :  { %v515_v20 = vsel %vm514_vm10, %v510_v18, 0.0  ;;  %v511_v21 = vmul.f32 %v487_v17, %v415_v8 }
 0x262   :  { %516 = vadd.xlane.f32.xlu0 %v515_v20  ;;  %v524_v24 = vsel %vm514_vm10, %v513_v19, 0.0 }
 0x263   :  { %v518_v22 = vsel %vm514_vm10, %v511_v21, 0.0 }
 0x264   :  { %519 = vadd.xlane.f32.xlu1 %v518_v22 }
 0x266   :  { %522 = vadd.xlane.f32.xlu0 %v521_v23 }
 0x26a   :  { %525 = vadd.xlane.f32.xlu0 %v524_v24 }
 0x2ef   :  { %v517_v27 = vpop.xlane.xlu0 %516 }
 0x2f0   :  { %v527_v32 = vmul.f32 0.17677669, %v517_v27 }
 0x2f1   :  { %v520_v30 = vpop.xlane.xlu1 %519 }
 0x2f2   :  { %v528_v35 = vmul.f32 0.17677669, %v520_v30  ;;  %v538_v40 = vrot.slane %v527_v32, %v2261_v31 }
 0x2f3   :  { %v523_v33 = vpop.xlane.xlu0 %522 }
 0x2f4   :  { %v543_v38 = vrot.slane %v528_v35, %v2257_v29  ;;  %v529_v39 = vmul.f32 0.17677669, %v523_v33 }
 0x2f6   :  { %v550_v45 = vrot.slane %v529_v39, %v2265_v37  ;;  %v545_v48 = vsel %vm544_vm11, %v543_v38, %v538_v40 }
 0x2f7   :  { %v526_v46 = vpop.xlane.xlu0 %525 }
 0x2f8   :  { %v530_v47 = vmul.f32 0.17677669, %v526_v46  ;;  %v552_v53 = vsel %vm551_vm12, %v550_v45, %v545_v48 }
 0x2fa   :  { %v557_v50 = vrot.slane %v530_v47, %v2270_v41 }
 0x2fc   :  { %v559_v54 = vsel %vm558_vm13, %v557_v50, %v552_v53 }
 0x2fd   :  { %v574_v55 = vsel %vm2279_vm14, %v559_v54, -1e+30  ;;  %v573_v58 = vsel %vm2284_vm15, %v559_v54, -1e+30 }
 0x2fe   :  { %v578_v59 = vsel %vm514_vm10, %v574_v55, -inf  ;;  %v575_v60 = vsel %vm514_vm10, %v573_v58, -inf  ;;  %v2318_v58 = vsel %vm2279_vm14, 1.0, %v1986_v1 }
 0x2ff   :  { %579 = vmax.xlane.f32.xlu0 %v578_v59  ;;  %576 = vmax.xlane.f32.xlu1 %v575_v60  ;;  %v2323_v59 = vsel %vm2284_vm15, 1.0, %v1986_v1 }
 0x38c   :  { %v580_v61 = vpop.xlane.xlu0 %579  ;;  %v577_v4 = vpop.xlane.xlu1 %576 }
 0x38d   :  { %v582_v5 = vsel %vm2279_vm14, %v580_v61, -1e+30  ;;  %v581_v6 = vsel %vm2284_vm15, %v577_v4, -1e+30 }
 0x38e   :  { %v584_v7 = vsel %vm514_vm10, %v582_v5, -inf  ;;  %v583_v8 = vsel %vm514_vm10, %v581_v6, -inf }
 0x38f   :  { %v585_v10 = vmax.f32 %v583_v8, %v584_v7 }
 0x391   :  { %v586_v12 = vrot.slane %v585_v10, 4 }
 0x393   :  { %v587_v14 = vmax.f32 %v585_v10, %v586_v12 }
 0x395   :  { %v588_v16 = vrot.slane %v587_v14, 2 }
 0x397   :  { %v589_v17 = vmax.f32 %v587_v14, %v588_v16 }
 0x399   :  { %v590_v18 = vrot.slane %v589_v17, 1 }
 0x39b   :  { %v591_v19 = vmax.f32 %v589_v17, %v590_v18 }
 0x39d   :  { %598 = vbcast.lane.b32.xlu0 %v591_v19, 264  ;;  %594 = vbcast.lane.b32.xlu1 %v591_v19, 256 }
 0x3a1   :  { %602 = vbcast.lane.b32.xlu1 %v591_v19, 272 }
 0x3a5   :  { %606 = vbcast.lane.b32.xlu1 %v591_v19, 280 }
 0x40f   :  { %v599_v20 = vpop.permute.xlu0 %598  ;;  %v595_v21 = vpop.permute.xlu1 %594 }
 0x410   :  { %v613_v22 = vsub.f32 %v528_v35, %v599_v20  ;;  %v612_v23 = vsub.f32 %v527_v32, %v595_v21 }
 0x412   :  { %v618_v24 = vmul.f32 1.442695, %v613_v22  ;;  %v616_v25 = vmul.f32 1.442695, %v612_v23 }
 0x413   :  { %v603_v27 = vpop.permute.xlu1 %602 }
 0x414   :  { %1921 = vpow2.f32 %v618_v24  ;;  %v614_v28 = vsub.f32 %v529_v39, %v603_v27  ;;  %v1917_v27 = vld [vmem:[%s2576_s7] sm:$0xff]  }
 0x415   :  { %1923 = vpow2.f32 %v616_v25  ;;  %1827 = vmatpush3.bf16.msra.mxu1 %v1917_v27 }
 0x416   :  { %v620_v30 = vmul.f32 1.442695, %v614_v28  ;;  %1828 = vmatprep.subr.bf16.mxu1 %v1986_v1  ;;  %v1918_v28 = vld [vmem:[%s2576_s7 + $0x8] sm:$0xff]  }
 0x417   :  { %v607_v36 = vpop.permute.xlu1 %606 }
 0x418   :  { %1925 = vpow2.f32 %v620_v30  ;;  %v615_v33 = vsub.f32 %v530_v47, %v607_v36 }
 0x419   :  { %1829 = vmatpush3.bf16.msra.mxu1 %v1918_v28 }
 0x41a   :  { %v622_v38 = vmul.f32 1.442695, %v615_v33 }
 0x41c   :  { %1927 = vpow2.f32 %v622_v38 }
 0x41e   :  { %v1922_v40 = vpop.eup %1921 }
 0x41f   :  { %v1924_v43 = vpop.eup %1923  ;;  %632 = vperm.xlu1 %1900, %v1922_v40  }
 0x420   :  { %629 = vperm.xlu0 %1899, %v1924_v43  }
 0x422   :  { %v1926_v45 = vpop.eup %1925 }
 0x424   :  { %635 = vperm.xlu0 %1899, %v1926_v45  }
 0x426   :  { %v1928_v35 = vpop.eup %1927 }
 0x427   :  { %638 = vperm.xlu1 %1900, %v1928_v35  }
 0x428   :  { %494 = vrot.lane.b32.xlu0 %v2220_v0, %s1991_s1 }
 0x42b   :  { %496 = vrot.lane.b32.xlu1 %v2224_v3, %s1991_s1 }
 0x42c   :  { %498 = vrot.lane.b32.xlu0 %v2218_v63, %s1991_s1 }
 0x42f   :  { %500 = vrot.lane.b32.xlu1 %v2222_v2, %s1991_s1 }
 0x49e   :  { %v633_v39 = vpop.permute.xlu1 %632 }
 0x49f   :  { %v630_v32 = vpop.permute.xlu0 %629  ;;  %v647_v34 = vrot.slane %v633_v39, %v2257_v29 }
 0x4a0   :  { %v643_v46 = vrot.slane %v630_v32, %v2261_v31 }
 0x4a2   :  { %v648_v53 = vsel %vm544_vm11, %v647_v34, %v643_v46  ;;  %v1689_v34 = vld [vmem:[%s2577_s8] ss:$0 sm:$0xff] }
 0x4a3   :  { %v636_v47 = vpop.permute.xlu0 %635 }
 0x4a4   :  { %v652_v48 = vrot.slane %v636_v47, %v2265_v37 }
 0x4a6   :  { %v639_v50 = vpop.permute.xlu1 %638  ;;  %v653_v60 = vsel %vm551_vm12, %v652_v48, %v648_v53 }
 0x4a7   :  { %v495_v54 = vpop.permute.xlu0 %494  ;;  %v657_v55 = vrot.slane %v639_v50, %v2270_v41 }
 0x4a8   :  { %v506_v7 = vadd.f32 %v495_v54, %v2235_v11 }
 0x4a9   :  { %v658_v61 = vsel %vm558_vm13, %v657_v55, %v653_v60 }
 0x4aa   :  { %v497_v4 = vpop.permute.xlu1 %496  ;;  %v667_v5 = vmul.f32 %v2318_v58, %v658_v61  ;;  %v666_v6 = vmul.f32 %v2323_v59, %v658_v61 }
 0x4ab   :  { %v507_v8 = vadd.f32 %v497_v4, %v2243_v15  ;;  %v499_v10 = vpop.permute.xlu0 %498 }
 0x4ac   :  { %v671_v12 = vsel %vm514_vm10, %v667_v5, 0.0  ;;  %v668_v14 = vsel %vm514_vm10, %v666_v6, 0.0  ;;  %v508_v18 = vadd.f32 %v2231_v9, %v499_v10 }
 0x4ad   :  { %v681_v16 = vpack.c.bf16 %v507_v8, %v506_v7  ;;  %672 = vadd.xlane.f32.xlu1 %v671_v12  ;;  %669 = vadd.xlane.f32.xlu0 %v668_v14 }
 0x4ae   :  { %v501_v17 = vpop.permute.xlu1 %500 }
 0x4af   :  { %v509_v19 = vadd.f32 %v2239_v13, %v501_v17 }
 0x4b1   :  { %v682_v20 = vpack.c.bf16 %v509_v19, %v508_v18 }
 0x4be   :  { %687 = vrot.lane.b32.xlu1 %v682_v20, %s1990_s6 }
 0x4c2   :  { %695 = vrot.lane.b32.xlu1 %v2204_v57, %s1991_s1 }
 0x4c3   :  { %685 = vrot.lane.b32.xlu0 %v681_v16, %s1990_s6 }
 0x4c6   :  { %916 = vrot.lane.b32.xlu1 %v2220_v0, %s1990_s6 }
 0x4c7   :  { %693 = vrot.lane.b32.xlu0 %v2202_v56, %s1991_s1 }
 0x4ca   :  { %920 = vrot.lane.b32.xlu1 %v2218_v63, %s1990_s6 }
 0x53a   :  { %v670_v9 = vpop.xlane.xlu0 %669  ;;  %v673_v11 = vpop.xlane.xlu1 %672 }
 0x53b   :  { %v674_v13 = vadd.f32 1e-16, %v670_v9  ;;  %v675_v15 = vadd.f32 1e-16, %v673_v11 }
 0x53d   :  { %1929 = vrcp.f32 %v674_v13 }
 0x53e   :  { %1931 = vrcp.f32 %v675_v15  ;;  %v686_v21 = vpop.permute.xlu0 %685  ;;  %v688_v57 = vpop.permute.xlu1 %687 }
 0x53f   :  { %1819 = vmatpush3.bf16.msra.mxu0 %v686_v21 }
 0x540   :  { %1820 = vmatprep.subr.bf16.mxu0 %v1986_v1 }
 0x542   :  { %v694_v30 = vpop.permute.xlu0 %693  ;;  %v696_v40 = vpop.permute.xlu1 %695 }
 0x543   :  { %1821 = vmatpush3.bf16.msra.mxu0 %v688_v57 }
 0x546   :  { %v2383_v8 = vpop.permute.xlu1 %916 }
 0x547   :  { %v1930_v22 = vpop.eup %1929 }
 0x548   :  { %v1932_v23 = vpop.eup %1931  ;;  %v678_v24 = vmul.f32 %v1930_v22, %v666_v6 }
 0x549   :  { %v679_v25 = vmul.f32 %v1932_v23, %v667_v5 }
 0x54a   :  { %v2387_v12 = vpop.permute.xlu1 %920 }
 0x54b   :  { %v680_v56 = vpack.c.bf16 %v679_v25, %v678_v24 }
 0x54d   :  { %1823 = vmatmul.mubr.msk.bf16.vlgmr.msra.gmra.mrb[8].mxu0 %vm514_vm10, %v680_v56 }
 0x54e   :  { %1836 = vmatprep.mubr.msk.bf16.mxu0 %vm371_vm5, %v2193_v49 }
 0x620   :  { %v736_v36 = vpop.f32.mrb[8].mxu0 }
 0x621   :  { %v737_v33 = vadd.f32 %v736_v36, %v694_v30  ;;  %v1824_v38 = vpop.f32.mrb[9].mxu0 }
 0x622   :  { %v739_v43 = vpop.f32.mrb[10].mxu0 }
 0x623   :  { %v740_v45 = vadd.f32 %v739_v43, %v696_v40  ;;  %v1825_v35 = vpop.f32.mrb[11].mxu0  ;;  %v743_v32 = vmax.f32 %v737_v33, 0.0 }
 0x625   :  { %v744_v39 = vmax.f32 %v740_v45, 0.0 }
 0x627   :  { %v745_v46 = vpack.c.bf16 %v744_v39, %v743_v32 }
 0x629   :  { %1831 = vmatmul.mubr.msk.bf16.vlgmr.msra.gmra.mrb[8].mxu1 %vm514_vm10, %v745_v46 }
 0x62a   :  { %1842 = vmatprep.mubr.msk.bf16.mxu1 %vm371_vm5, %v2185_v44 }
 0x6fc   :  { %v806_v47 = vpop.f32.mrb[8].mxu1 }
 0x6fd   :  { %v1832_v48 = vpop.f32.mrb[9].mxu1  ;;  %v2362_v53 = vadd.f32 %v1689_v34, %v806_v47 }
 0x6fe   :  { %v809_v50 = vpop.f32.mrb[10].mxu1 }
 0x6ff   :  { %v2364_v54 = vadd.f32 %v1689_v34, %v809_v50  ;;  %v1833_v55 = vpop.f32.mrb[11].mxu1 }
 0x701   :  { %v813_v60 = vpack.c.bf16 %v2364_v54, %v2362_v53 }
 0x703   :  { %864 = vrot.lane.b32.xlu0 %v813_v60, %s1990_s6  ;;  %1834 = vmatprep.subr.bf16.mxu0 %v813_v60 }
 0x704   :  { %1835 = vmatpush3.bf16.msra.mxu0 %v813_v60 }
 0x705   :  { %1846 = vmatprep.subr.bf16.mxu0 %v1986_v1 }
 0x707   :  { %918 = vrot.lane.b32.xlu0 %v2224_v3, %s1990_s6  ;;  %1837 = vmatmul.mubr.msk.bf16.vlgmr.msra.gmra.mrb[12].mxu0 %vm371_vm5, %v2211_v62 }
 0x708   :  { %1850 = vmatprep.mubr.msk.bf16.mxu0 %vm1987_vm0, %v1986_v1 }
 0x70b   :  { %922 = vrot.lane.b32.xlu0 %v2222_v2, %s1990_s6 }
 0x775   :  { %v865_v61 = vpop.permute.xlu0 %864 }
 0x776   :  { %1840 = vmatprep.subr.bf16.mxu1 %v865_v61 }
 0x777   :  { %1841 = vmatpush3.bf16.msra.mxu1 %v865_v61 }
 0x778   :  { %1854 = vmatprep.subr.bf16.mxu1 %v1986_v1 }
 0x779   :  { %v2385_v10 = vpop.permute.xlu0 %918 }
 0x77a   :  { %1843 = vmatmul.mubr.msk.bf16.vlgmr.msra.gmra.mrb[12].mxu1 %vm371_vm5, %v2182_v42 }
 0x77b   :  { %1858 = vmatprep.mubr.msk.bf16.mxu1 %vm1987_vm0, %v1986_v1 }
 0x77d   :  { %v2393_v19 = vpop.permute.xlu0 %922 }
 0x7da   :  { %v1838_v4 = vpop.f32.mrb[12].mxu0 }
 0x7db   :  { %v848_v5 = vpop.f32.mrb[13].mxu0 }
 0x7dc   :  { %v1839_v6 = vpop.f32.mrb[14].mxu0 }
 0x7dd   :  { %v851_v7 = vpop.f32.mrb[15].mxu0 }
 0x84d   :  { %v1844_v14 = vpop.f32.mrb[12].mxu1 }
 0x84e   :  { %v930_v16 = vadd.f32 %v1844_v14, %v2387_v12  ;;  %v2391_v17 = vadd.f32 %v1844_v14, %v2218_v63  ;;  %v901_v18 = vpop.f32.mrb[13].mxu1 }
 0x84f   :  { %v928_v20 = vadd.f32 %v2383_v8, %v901_v18  ;;  %v2397_v9 = vadd.f32 %v901_v18, %v2220_v0  ;;  %v1845_v11 = vpop.f32.mrb[14].mxu1 }
 0x850   :  { %v931_v13 = vadd.f32 %v1845_v11, %v2393_v19  ;;  %v2401_v15 = vadd.f32 %v1845_v11, %v2222_v2  ;;  %v904_v21 = vpop.f32.mrb[15].mxu1  ;;  %v938_v57 = vmul.f32 %v1838_v4, %v930_v16 }
 0x851   :  { %v929_v22 = vadd.f32 %v2385_v10, %v904_v21  ;;  %v2405_v23 = vadd.f32 %v904_v21, %v2224_v3  ;;  %v936_v24 = vmul.f32 %v928_v20, %v848_v5 }
 0x852   :  { %v1095_v25 = vpack.c.bf16 %v2401_v15, %v2391_v17  ;;  %v939_v56 = vmul.f32 %v1839_v6, %v931_v13  ;;  %v946_v38 = vsel %vm514_vm10, %v938_v57, 0.0 }
 0x853   :  { %v1094_v27 = vpack.c.bf16 %v2405_v23, %v2397_v9  ;;  %v940_v28 = vsel %vm514_vm10, %v936_v24, 0.0  ;;  %v937_v30 = vmul.f32 %v929_v22, %v851_v7 }
 0x854   :  { %941 = vadd.xlane.f32.xlu1 %v940_v28  ;;  %v949_v33 = vsel %vm514_vm10, %v939_v56, 0.0 }
 0x855   :  { %v943_v36 = vsel %vm514_vm10, %v937_v30, 0.0 }
 0x856   :  { %944 = vadd.xlane.f32.xlu0 %v943_v36 }
 0x858   :  { %950 = vadd.xlane.f32.xlu1 %v949_v33 }
 0x85a   :  { %947 = vadd.xlane.f32.xlu0 %v946_v38 }
 0x8e1   :  { %v942_v40 = vpop.xlane.xlu1 %941 }
 0x8e2   :  { %v952_v35 = vmul.f32 0.17677669, %v942_v40 }
 0x8e3   :  { %v945_v43 = vpop.xlane.xlu0 %944 }
 0x8e4   :  { %v953_v45 = vmul.f32 0.17677669, %v945_v43  ;;  %v963_v48 = vrot.slane %v952_v35, %v2261_v31 }
 0x8e5   :  { %v951_v32 = vpop.xlane.xlu1 %950 }
 0x8e6   :  { %v967_v39 = vrot.slane %v953_v45, %v2257_v29  ;;  %v955_v46 = vmul.f32 0.17677669, %v951_v32 }
 0x8e7   :  { %v948_v34 = vpop.xlane.xlu0 %947 }
 0x8e8   :  { %v954_v47 = vmul.f32 0.17677669, %v948_v34  ;;  %v977_v55 = vrot.slane %v955_v46, %v2270_v41  ;;  %v968_v60 = vsel %vm544_vm11, %v967_v39, %v963_v48 }
 0x8ea   :  { %v972_v50 = vrot.slane %v954_v47, %v2265_v37 }
 0x8ec   :  { %v973_v61 = vsel %vm551_vm12, %v972_v50, %v968_v60 }
 0x8ed   :  { %v978_v4 = vsel %vm558_vm13, %v977_v55, %v973_v61 }
 0x8ee   :  { %v987_v5 = vsel %vm2279_vm14, %v978_v4, -1e+30  ;;  %v986_v6 = vsel %vm2284_vm15, %v978_v4, -1e+30 }
 0x8ef   :  { %v991_v7 = vsel %vm514_vm10, %v987_v5, -inf  ;;  %v988_v14 = vsel %vm514_vm10, %v986_v6, -inf }
 0x8f0   :  { %992 = vmax.xlane.f32.xlu1 %v991_v7  ;;  %989 = vmax.xlane.f32.xlu0 %v988_v14 }
 0x97d   :  { %v993_v16 = vpop.xlane.xlu1 %992  ;;  %v990_v18 = vpop.xlane.xlu0 %989 }
 0x97e   :  { %v995_v20 = vsel %vm2279_vm14, %v993_v16, -1e+30  ;;  %v994_v11 = vsel %vm2284_vm15, %v990_v18, -1e+30 }
 0x97f   :  { %v997_v13 = vsel %vm514_vm10, %v995_v20, -inf  ;;  %v996_v21 = vsel %vm514_vm10, %v994_v11, -inf }
 0x980   :  { %v998_v57 = vmax.f32 %v996_v21, %v997_v13 }
 0x982   :  { %v999_v22 = vrot.slane %v998_v57, 4 }
 0x984   :  { %v1000_v24 = vmax.f32 %v998_v57, %v999_v22 }
 0x986   :  { %v1001_v56 = vrot.slane %v1000_v24, 2 }
 0x988   :  { %v1002_v28 = vmax.f32 %v1000_v24, %v1001_v56 }
 0x98a   :  { %v1003_v30 = vrot.slane %v1002_v28, 1 }
 0x98c   :  { %v1004_v36 = vmax.f32 %v1002_v28, %v1003_v30 }
 0x98e   :  { %1011 = vbcast.lane.b32.xlu1 %v1004_v36, 264  ;;  %1007 = vbcast.lane.b32.xlu0 %v1004_v36, 256 }
 0x992   :  { %1015 = vbcast.lane.b32.xlu1 %v1004_v36, 272  ;;  %1019 = vbcast.lane.b32.xlu0 %v1004_v36, 280  ;;  %v1920_v36 = vld [vmem:[#allocation3 + $0x8] sm:$0xff]  }
 0xa00   :  { %v1012_v33 = vpop.permute.xlu1 %1011  ;;  %v1008_v38 = vpop.permute.xlu0 %1007 }
 0xa01   :  { %v1026_v40 = vsub.f32 %v953_v45, %v1012_v33  ;;  %v1025_v43 = vsub.f32 %v952_v35, %v1008_v38 }
 0xa03   :  { %v1031_v32 = vmul.f32 1.442695, %v1026_v40  ;;  %v1029_v39 = vmul.f32 1.442695, %v1025_v43 }
 0xa04   :  { %v1016_v34 = vpop.permute.xlu1 %1015  ;;  %v1020_v48 = vpop.permute.xlu0 %1019 }
 0xa05   :  { %1933 = vpow2.f32 %v1031_v32  ;;  %v1027_v50 = vsub.f32 %v954_v47, %v1016_v34  ;;  %v1028_v55 = vsub.f32 %v955_v46, %v1020_v48 }
 0xa06   :  { %1935 = vpow2.f32 %v1029_v39 }
 0xa07   :  { %v1033_v60 = vmul.f32 1.442695, %v1027_v50  ;;  %v1035_v61 = vmul.f32 1.442695, %v1028_v55 }
 0xa09   :  { %1937 = vpow2.f32 %v1033_v60 }
 0xa0a   :  { %1939 = vpow2.f32 %v1035_v61 }
 0xa0f   :  { %v1934_v4 = vpop.eup %1933 }
 0xa10   :  { %v1936_v5 = vpop.eup %1935  ;;  %1045 = vperm.xlu0 %1899, %v1934_v4  }
 0xa11   :  { %1042 = vperm.xlu1 %1900, %v1936_v5  }
 0xa13   :  { %v1938_v6 = vpop.eup %1937 }
 0xa14   :  { %v1940_v7 = vpop.eup %1939 }
 0xa15   :  { %1048 = vperm.xlu1 %1900, %v1938_v6   ;;  %1051 = vperm.xlu0 %1899, %v1940_v7  }
 0xa8f   :  { %v1046_v45 = vpop.permute.xlu0 %1045 }
 0xa90   :  { %v1043_v35 = vpop.permute.xlu1 %1042  ;;  %v1060_v47 = vrot.slane %v1046_v45, %v2257_v29 }
 0xa91   :  { %v1056_v14 = vrot.slane %v1043_v35, %v2261_v31 }
 0xa93   :  { %v1061_v11 = vsel %vm544_vm11, %v1060_v47, %v1056_v14 }
 0xa94   :  { %v1049_v46 = vpop.permute.xlu1 %1048  ;;  %v1052_v16 = vpop.permute.xlu0 %1051 }
 0xa95   :  { %v1065_v18 = vrot.slane %v1049_v46, %v2265_v37  ;;  %v1070_v20 = vrot.slane %v1052_v16, %v2270_v41 }
 0xa97   :  { %v1066_v13 = vsel %vm551_vm12, %v1065_v18, %v1061_v11 }
 0xa98   :  { %v1071_v21 = vsel %vm558_vm13, %v1070_v20, %v1066_v13 }
 0xa99   :  { %v1080_v57 = vmul.f32 %v2318_v58, %v1071_v21  ;;  %v1079_v22 = vmul.f32 %v2323_v59, %v1071_v21 }
 0xa9b   :  { %v1084_v24 = vsel %vm514_vm10, %v1080_v57, 0.0  ;;  %v1081_v56 = vsel %vm514_vm10, %v1079_v22, 0.0 }
 0xa9c   :  { %1085 = vadd.xlane.f32.xlu0 %v1084_v24  ;;  %1082 = vadd.xlane.f32.xlu1 %v1081_v56 }
 0xaad   :  { %1100 = vrot.lane.b32.xlu1 %v1095_v25, %s1990_s6 }
 0xab1   :  { %1106 = vrot.lane.b32.xlu1 %v2362_v53, %s1991_s1 }
 0xab2   :  { %1098 = vrot.lane.b32.xlu0 %v1094_v27, %s1990_s6 }
 0xab6   :  { %1108 = vrot.lane.b32.xlu0 %v2364_v54, %s1991_s1 }
 0xaba   :  { %1329 = vrot.lane.b32.xlu0 %v2220_v0, %s1984_s24 }
 0xabe   :  { %1333 = vrot.lane.b32.xlu0 %v2218_v63, %s1984_s24  ;;  %v1919_v63 = vld [vmem:[#allocation3] sm:$0xff]  }
 0xabf   :  { %1855 = vmatpush3.bf16.msra.mxu1 %v1919_v63 }
 0xac0   :  { %1856 = vmatprep.subr.bf16.mxu1 %v1986_v1 }
 0xac3   :  { %1857 = vmatpush3.bf16.msra.mxu1 %v1920_v36 }
 0xb29   :  { %v1086_v28 = vpop.xlane.xlu0 %1085  ;;  %v1083_v17 = vpop.xlane.xlu1 %1082 }
 0xb2a   :  { %v1088_v15 = vadd.f32 1e-16, %v1086_v28  ;;  %v1087_v25 = vadd.f32 1e-16, %v1083_v17 }
 0xb2c   :  { %1941 = vrcp.f32 %v1088_v15 }
 0xb2d   :  { %1943 = vrcp.f32 %v1087_v25  ;;  %v1099_v53 = vpop.permute.xlu0 %1098  ;;  %v1101_v9 = vpop.permute.xlu1 %1100 }
 0xb2e   :  { %1847 = vmatpush3.bf16.msra.mxu0 %v1099_v53 }
 0xb2f   :  { %1848 = vmatprep.subr.bf16.mxu0 %v1986_v1 }
 0xb31   :  { %v1107_v33 = vpop.permute.xlu1 %1106  ;;  %v1109_v32 = vpop.permute.xlu0 %1108 }
 0xb32   :  { %1849 = vmatpush3.bf16.msra.mxu0 %v1101_v9 }
 0xb35   :  { %v1330_v46 = vpop.permute.xlu0 %1329 }
 0xb36   :  { %v1942_v23 = vpop.eup %1941 }
 0xb37   :  { %v1944_v54 = vpop.eup %1943  ;;  %v1092_v27 = vmul.f32 %v1942_v23, %v1080_v57 }
 0xb38   :  { %v1091_v30 = vmul.f32 %v1944_v54, %v1079_v22 }
 0xb39   :  { %v1334_v18 = vpop.permute.xlu0 %1333 }
 0xb3a   :  { %v1093_v0 = vpack.c.bf16 %v1092_v27, %v1091_v30 }
 0xb3c   :  { %1851 = vmatmul.mubr.msk.bf16.vlgmr.msra.gmra.mrb[16].mxu0 %vm514_vm10, %v1093_v0 }
 0xb3d   :  { %1864 = vmatprep.mubr.msk.bf16.mxu0 %vm371_vm5, %v2193_v49  ;;  %v1698_v49 = vld [vmem:[%s2579_s10] ss:$0 sm:$0xff] }
 0xc0f   :  { %v1149_v38 = vpop.f32.mrb[16].mxu0 }
 0xc10   :  { %v1150_v40 = vadd.f32 %v1149_v38, %v1107_v33  ;;  %v1852_v43 = vpop.f32.mrb[17].mxu0 }
 0xc11   :  { %v1152_v39 = vpop.f32.mrb[18].mxu0 }
 0xc12   :  { %v1153_v34 = vadd.f32 %v1152_v39, %v1109_v32  ;;  %v1853_v48 = vpop.f32.mrb[19].mxu0  ;;  %v1156_v50 = vmax.f32 %v1150_v40, 0.0 }
 0xc14   :  { %v1157_v55 = vmax.f32 %v1153_v34, 0.0 }
 0xc16   :  { %v1158_v60 = vpack.c.bf16 %v1157_v55, %v1156_v50 }
 0xc18   :  { %1859 = vmatmul.mubr.msk.bf16.vlgmr.msra.gmra.mrb[16].mxu1 %vm514_vm10, %v1158_v60 }
 0xc19   :  { %1870 = vmatprep.mubr.msk.bf16.mxu1 %vm371_vm5, %v2185_v44 }
 0xceb   :  { %v1219_v61 = vpop.f32.mrb[16].mxu1 }
 0xcec   :  { %v1860_v4 = vpop.f32.mrb[17].mxu1  ;;  %v2472_v6 = vadd.f32 %v1698_v49, %v1219_v61 }
 0xced   :  { %v1222_v5 = vpop.f32.mrb[18].mxu1 }
 0xcee   :  { %v2474_v7 = vadd.f32 %v1698_v49, %v1222_v5  ;;  %v1861_v45 = vpop.f32.mrb[19].mxu1 }
 0xcf0   :  { %v1226_v35 = vpack.c.bf16 %v2474_v7, %v2472_v6 }
 0xcf2   :  { %1277 = vrot.lane.b32.xlu1 %v1226_v35, %s1990_s6  ;;  %1862 = vmatprep.subr.bf16.mxu0 %v1226_v35 }
 0xcf3   :  { %1863 = vmatpush3.bf16.msra.mxu0 %v1226_v35 }
 0xcf4   :  { %1874 = vmatprep.subr.bf16.mxu0 %v1986_v1 }
 0xcf6   :  { %1331 = vrot.lane.b32.xlu1 %v2224_v3, %s1984_s24  ;;  %1865 = vmatmul.mubr.msk.bf16.vlgmr.msra.gmra.mrb[20].mxu0 %vm371_vm5, %v2211_v62 }
 0xcf7   :  { %1878 = vmatprep.mubr.msk.bf16.mxu0 %vm1987_vm0, %v1986_v1 }
 0xcfa   :  { %1335 = vrot.lane.b32.xlu1 %v2222_v2, %s1984_s24 }
 0xd64   :  { %v1278_v44 = vpop.permute.xlu1 %1277 }
 0xd65   :  { %1868 = vmatprep.subr.bf16.mxu1 %v1278_v44 }
 0xd66   :  { %1869 = vmatpush3.bf16.msra.mxu1 %v1278_v44 }
 0xd67   :  { %1882 = vmatprep.subr.bf16.mxu1 %v1986_v1 }
 0xd68   :  { %v1332_v16 = vpop.permute.xlu1 %1331 }
 0xd69   :  { %1871 = vmatmul.mubr.msk.bf16.vlgmr.msra.gmra.mrb[20].mxu1 %vm371_vm5, %v2182_v42 }
 0xd6a   :  { %1884 = vmatprep.mubr.msk.bf16.mxu1 %vm1987_vm0, %v1986_v1 }
 0xd6c   :  { %v1336_v13 = vpop.permute.xlu1 %1335 }
 0xdc9   :  { %v1866_v3 = vpop.f32.mrb[20].mxu0 }
 0xdca   :  { %v1261_v14 = vpop.f32.mrb[21].mxu0 }
 0xdcb   :  { %v1867_v62 = vpop.f32.mrb[22].mxu0 }
 0xdcc   :  { %v1264_v47 = vpop.f32.mrb[23].mxu0 }
 0xe3c   :  { %v1872_v20 = vpop.f32.mrb[20].mxu1 }
 0xe3d   :  { %v1343_v2 = vadd.f32 %v1872_v20, %v1334_v18  ;;  %v1314_v11 = vpop.f32.mrb[21].mxu1  ;;  %v2494_v22 = vadd.f32 %v1872_v20, %v2387_v12 }
 0xe3e   :  { %v1341_v21 = vadd.f32 %v1330_v46, %v1314_v11  ;;  %v1873_v57 = vpop.f32.mrb[22].mxu1  ;;  %v2500_v17 = vadd.f32 %v1314_v11, %v2383_v8 }
 0xe3f   :  { %v1344_v42 = vadd.f32 %v1873_v57, %v1336_v13  ;;  %v2497_v24 = vadd.f32 %v1873_v57, %v2393_v19  ;;  %v1317_v56 = vpop.f32.mrb[23].mxu1  ;;  %v1351_v28 = vmul.f32 %v1866_v3, %v1343_v2 }
 0xe40   :  { %v1342_v15 = vadd.f32 %v1332_v16, %v1317_v56  ;;  %v2503_v25 = vadd.f32 %v1317_v56, %v2385_v10  ;;  %v1349_v53 = vmul.f32 %v1341_v21, %v1261_v14 }
 0xe41   :  { %v1508_v9 = vpack.c.bf16 %v2497_v24, %v2494_v22  ;;  %v1352_v23 = vmul.f32 %v1867_v62, %v1344_v42  ;;  %v1359_v8 = vsel %vm514_vm10, %v1351_v28, 0.0 }
 0xe42   :  { %v1507_v12 = vpack.c.bf16 %v2503_v25, %v2500_v17  ;;  %v1353_v19 = vsel %vm514_vm10, %v1349_v53, 0.0  ;;  %v1350_v54 = vmul.f32 %v1342_v15, %v1264_v47 }
 0xe43   :  { %1354 = vadd.xlane.f32.xlu0 %v1353_v19  ;;  %v1362_v10 = vsel %vm514_vm10, %v1352_v23, 0.0 }
 0xe44   :  { %v1356_v27 = vsel %vm514_vm10, %v1350_v54, 0.0 }
 0xe45   :  { %1357 = vadd.xlane.f32.xlu1 %v1356_v27 }
 0xe47   :  { %1360 = vadd.xlane.f32.xlu0 %v1359_v8 }
 0xe4b   :  { %1363 = vadd.xlane.f32.xlu0 %v1362_v10 }
 0xed0   :  { %v1355_v30 = vpop.xlane.xlu0 %1354 }
 0xed1   :  { %v1365_v63 = vmul.f32 0.17677669, %v1355_v30 }
 0xed2   :  { %v1358_v0 = vpop.xlane.xlu1 %1357 }
 0xed3   :  { %v1366_v36 = vmul.f32 0.17677669, %v1358_v0  ;;  %v1376_v43 = vrot.slane %v1365_v63, %v2261_v31 }
 0xed4   :  { %v1361_v33 = vpop.xlane.xlu0 %1360 }
 0xed5   :  { %v1380_v38 = vrot.slane %v1366_v36, %v2257_v29  ;;  %v1367_v40 = vmul.f32 0.17677669, %v1361_v33 }
 0xed7   :  { %v1385_v32 = vrot.slane %v1367_v40, %v2265_v37  ;;  %v1381_v48 = vsel %vm544_vm11, %v1380_v38, %v1376_v43 }
 0xed8   :  { %v1364_v39 = vpop.xlane.xlu0 %1363 }
 0xed9   :  { %v1368_v34 = vmul.f32 0.17677669, %v1364_v39  ;;  %v1386_v55 = vsel %vm551_vm12, %v1385_v32, %v1381_v48 }
 0xedb   :  { %v1390_v50 = vrot.slane %v1368_v34, %v2270_v41 }
 0xedd   :  { %v1391_v60 = vsel %vm558_vm13, %v1390_v50, %v1386_v55 }
 0xede   :  { %v1400_v49 = vsel %vm2279_vm14, %v1391_v60, -1e+30  ;;  %v1399_v61 = vsel %vm2284_vm15, %v1391_v60, -1e+30 }
 0xedf   :  { %v1404_v4 = vsel %vm514_vm10, %v1400_v49, -inf  ;;  %v1401_v5 = vsel %vm514_vm10, %v1399_v61, -inf }
 0xee0   :  { %1405 = vmax.xlane.f32.xlu0 %v1404_v4  ;;  %1402 = vmax.xlane.f32.xlu1 %v1401_v5 }
 0xf6d   :  { %v1406_v45 = vpop.xlane.xlu0 %1405  ;;  %v1403_v35 = vpop.xlane.xlu1 %1402 }
 0xf6e   :  { %v1408_v44 = vsel %vm2279_vm14, %v1406_v45, -1e+30  ;;  %v1407_v3 = vsel %vm2284_vm15, %v1403_v35, -1e+30 }
 0xf6f   :  { %v1410_v14 = vsel %vm514_vm10, %v1408_v44, -inf  ;;  %v1409_v62 = vsel %vm514_vm10, %v1407_v3, -inf }
 0xf70   :  { %v1411_v47 = vmax.f32 %v1409_v62, %v1410_v14 }
 0xf72   :  { %v1412_v46 = vrot.slane %v1411_v47, 4 }
 0xf74   :  { %v1413_v16 = vmax.f32 %v1411_v47, %v1412_v46 }
 0xf76   :  { %v1414_v18 = vrot.slane %v1413_v16, 2 }
 0xf78   :  { %v1415_v20 = vmax.f32 %v1413_v16, %v1414_v18  ;;  %v1710_v16 = vld [vmem:[%s2581_s12] ss:$0 sm:$0xff] }
 0xf7a   :  { %v1416_v2 = vrot.slane %v1415_v20, 1 }
 0xf7c   :  { %v1417_v11 = vmax.f32 %v1415_v20, %v1416_v2 }
 0xf7e   :  { %1424 = vbcast.lane.b32.xlu0 %v1417_v11, 264  ;;  %1420 = vbcast.lane.b32.xlu1 %v1417_v11, 256 }
 0xf82   :  { %1428 = vbcast.lane.b32.xlu1 %v1417_v11, 272 }
 0xf86   :  { %1432 = vbcast.lane.b32.xlu1 %v1417_v11, 280 }
 0xff0   :  { %v1425_v51 = vpop.permute.xlu0 %1424  ;;  %v1421_v13 = vpop.permute.xlu1 %1420 }
 0xff1   :  { %v1439_v21 = vsub.f32 %v1366_v36, %v1425_v51  ;;  %v1438_v52 = vsub.f32 %v1365_v63, %v1421_v13 }
 0xff3   :  { %v1444_v57 = vmul.f32 1.442695, %v1439_v21  ;;  %v1442_v42 = vmul.f32 1.442695, %v1438_v52  ;;  %v1711_v21 = vld [vmem:[#allocation2] ss:$0 sm:$0xff] }
 0xff4   :  { %v1429_v56 = vpop.permute.xlu1 %1428 }
 0xff5   :  { %1945 = vpow2.f32 %v1444_v57  ;;  %v1440_v28 = vsub.f32 %v1367_v40, %v1429_v56 }
 0xff6   :  { %1947 = vpow2.f32 %v1442_v42 }
 0xff7   :  { %v1446_v15 = vmul.f32 1.442695, %v1440_v28 }
 0xff8   :  { %v1433_v53 = vpop.permute.xlu1 %1432 }
 0xff9   :  { %1949 = vpow2.f32 %v1446_v15  ;;  %v1441_v23 = vsub.f32 %v1368_v34, %v1433_v53 }
 0xffb   :  { %v1448_v19 = vmul.f32 1.442695, %v1441_v23 }
 0xffd   :  { %1951 = vpow2.f32 %v1448_v19 }
 0xfff   :  { %v1946_v54 = vpop.eup %1945 }
0x1000   :  { %v1948_v27 = vpop.eup %1947  ;;  %1458 = vperm.xlu1 %1900, %v1946_v54  }
0x1001   :  { %1455 = vperm.xlu0 %1899, %v1948_v27  }
0x1003   :  { %v1950_v8 = vpop.eup %1949 }
0x1005   :  { %1461 = vperm.xlu0 %1899, %v1950_v8  }
0x1007   :  { %v1952_v10 = vpop.eup %1951 }
0x1008   :  { %1464 = vperm.xlu1 %1900, %v1952_v10  }
0x107f   :  { %v1459_v0 = vpop.permute.xlu1 %1458 }
0x1080   :  { %v1456_v30 = vpop.permute.xlu0 %1455  ;;  %v1473_v36 = vrot.slane %v1459_v0, %v2257_v29 }
0x1081   :  { %v1469_v63 = vrot.slane %v1456_v30, %v2261_v31 }
0x1083   :  { %v1474_v43 = vsel %vm544_vm11, %v1473_v36, %v1469_v63 }
0x1084   :  { %v1462_v33 = vpop.permute.xlu0 %1461 }
0x1085   :  { %v1478_v38 = vrot.slane %v1462_v33, %v2265_v37 }
0x1087   :  { %v1465_v40 = vpop.permute.xlu1 %1464  ;;  %v1479_v39 = vsel %vm551_vm12, %v1478_v38, %v1474_v43 }
0x1088   :  { %v1483_v32 = vrot.slane %v1465_v40, %v2270_v41 }
0x108a   :  { %v1484_v34 = vsel %vm558_vm13, %v1483_v32, %v1479_v39 }
0x108b   :  { %v1493_v48 = vmul.f32 %v2318_v58, %v1484_v34  ;;  %v1492_v50 = vmul.f32 %v2323_v59, %v1484_v34 }
0x108d   :  { %v1497_v31 = vsel %vm514_vm10, %v1493_v48, 0.0  ;;  %v1494_v29 = vsel %vm514_vm10, %v1492_v50, 0.0 }
0x108e   :  { %1498 = vadd.xlane.f32.xlu1 %v1497_v31  ;;  %1495 = vadd.xlane.f32.xlu0 %v1494_v29 }
0x109f   :  { %1513 = vrot.lane.b32.xlu1 %v1508_v9, %s1990_s6 }
0x10a3   :  { %1521 = vrot.lane.b32.xlu1 %v2474_v7, %s1991_s1 }
0x10a4   :  { %1511 = vrot.lane.b32.xlu0 %v1507_v12, %s1990_s6 }
0x10a8   :  { %1519 = vrot.lane.b32.xlu0 %v2472_v6, %s1991_s1  ;;  %v1707_v6 = vld [vmem:[%s2571_s2] ss:$0 sm:$0xff] }
0x10a9   :  { %vm1574_vm0 = vcmp.eq.s32.totalorder %v2253_v26, %v1707_v6 }
0x10aa   :  { %v1708_v12 = vsel %vm1574_vm0, 1.0, %v1986_v1 }
0x10ab   :  { %v1623_v60 = vsel %vm1622_vm1, %v1708_v12, 0.0  ;;  %v1577_v62 = vpack.c.bf16 %v1708_v12, %v1708_v12 }
0x10c7   :  { %1624 = vadd.xlane.f32.xlu0 %v1623_v60 }
0x111b   :  { %v1499_v37 = vpop.xlane.xlu1 %1498  ;;  %v1496_v41 = vpop.xlane.xlu0 %1495 }
0x111c   :  { %v1501_v58 = vadd.f32 1e-16, %v1499_v37  ;;  %v1500_v59 = vadd.f32 1e-16, %v1496_v41 }
0x111e   :  { %1953 = vrcp.f32 %v1501_v58 }
0x111f   :  { %1955 = vrcp.f32 %v1500_v59  ;;  %v1512_v55 = vpop.permute.xlu0 %1511  ;;  %v1514_v22 = vpop.permute.xlu1 %1513 }
0x1120   :  { %1875 = vmatpush3.bf16.msra.mxu0 %v1512_v55 }
0x1121   :  { %1876 = vmatprep.subr.bf16.mxu0 %v1986_v1 }
0x1123   :  { %v1522_v61 = vpop.permute.xlu1 %1521  ;;  %v1520_v5 = vpop.permute.xlu0 %1519 }
0x1124   :  { %1877 = vmatpush3.bf16.msra.mxu0 %v1514_v22 }
0x1128   :  { %v1954_v7 = vpop.eup %1953 }
0x1129   :  { %v1956_v24 = vpop.eup %1955  ;;  %v1505_v9 = vmul.f32 %v1954_v7, %v1493_v48 }
0x112a   :  { %v1504_v17 = vmul.f32 %v1956_v24, %v1492_v50 }
0x112c   :  { %v1506_v25 = vpack.c.bf16 %v1505_v9, %v1504_v17 }
0x112e   :  { %1879 = vmatmul.mubr.msk.bf16.vlgmr.msra.gmra.mrb[24].mxu0 %vm514_vm10, %v1506_v25 }
0x1154   :  { %v1625_v47 = vpop.xlane.xlu0 %1624 }
0x1155   :  { %v1626_v26 = vmax.f32 %v1625_v47, 1.0 }
0x1157   :  { %1957 = vrcp.f32 %v1626_v26 }
0x1161   :  { %v1958_v1 = vpop.eup %1957 }
0x1201   :  { %v1562_v49 = vpop.f32.mrb[24].mxu0 }
0x1202   :  { %v1880_v4 = vpop.f32.mrb[25].mxu0  ;;  %v1563_v35 = vadd.f32 %v1562_v49, %v1520_v5 }
0x1203   :  { %v1565_v45 = vpop.f32.mrb[26].mxu0 }
0x1204   :  { %v1566_v44 = vadd.f32 %v1565_v45, %v1522_v61  ;;  %v1881_v3 = vpop.f32.mrb[27].mxu0 }
0x1206   :  { %v1578_v14 = vpack.c.bf16 %v1566_v44, %v1563_v35 }
0x1208   :  { %1883 = vmatpush3.bf16.msra.mxu1 %v1578_v14 }
0x120b   :  { %1885 = vmatmul.mubr.msk.bf16.vlgmr.msra.gmra.mrb[24].mxu1 %vm371_vm5, %v1577_v62 }
0x12de   :  { %v1616_v46 = vpop.f32.mrb[24].mxu1 }
0x12df   :  { %v1628_v18 = vmul.f32 %v1958_v1, %v1616_v46  ;;  %v1886_v20 = vpop.f32.mrb[25].mxu1 }
0x12e0   :  { %v1619_v2 = vpop.f32.mrb[26].mxu1 }
0x12e1   :  { %v1887_v11 = vpop.f32.mrb[27].mxu1  ;;  %v1636_v51 = vmul.f32 %v1710_v16, %v1628_v18 }
0x12e3   :  { %v1638_v13 = vsel %vm1637_vm2, %v1636_v51, 0.0 }
0x12e4   :  { %1639 = vadd.xlane.f32.xlu1 %v1638_v13 }
0x1371   :  { %v1640_v52 = vpop.xlane.xlu1 %1639 }
0x1372   :  { %v1648_v57 = vadd.f32 %v1711_v21, %v1640_v52 }
0x1374   :  { %1650 = vst.msk [vmem:[%s2583_s14] sm:$0x3] %vm1649_vm3, %v1648_v57 }
0x1375   :  { %1655 = vsyncpa [#allocation4], 1 }

</bundles_post_ra>
